<compile_context>
chip_gen: v5e
topology: v5e:2x2
jax: 0.10.0
libtpu: 0.0.40
codegen_flags: <defaults>
</compile_context>

<pallas_src>
import functools

import jax
import jax.numpy as jnp
from jax import lax
from jax.experimental import pallas as pl
from jax.experimental.pallas import tpu as pltpu

EPS = 1e-5            # PyTorch LayerNorm default eps
NEG = -1e30           # "minus infinity" that stays NaN-free under subtraction
VMEM_LIMIT = 32 * 1024 * 1024   # explicit scoped-VMEM budget (safe on v5e/v6e/v7x)


# ----------------------------- kernel helpers ------------------------------
def _layernorm(x, gamma, beta):
    mu = jnp.mean(x, axis=-1, keepdims=True)
    xc = x - mu
    var = jnp.mean(xc * xc, axis=-1, keepdims=True)
    return xc * lax.rsqrt(var + EPS) * gamma + beta


def _mm(a, w_ref, b_ref):
    """x @ W + b with storage-dtype matmul inputs and f32 accumulation."""
    w = w_ref[...]
    return (jnp.dot(a.astype(w.dtype), w, preferred_element_type=jnp.float32)
            + b_ref[...].astype(jnp.float32))


# --------------------------- kernel 1: LN + MLP -----------------------------
def ln_mlp_kernel(x_ref, g_ref, b_ref, w1_ref, b1_ref, w2_ref, b2_ref, o_ref):
    # x tile: [T, 2D] -> LayerNorm(2D) -> Linear(2D,4D) -> ReLU -> Linear(4D,D)
    x = x_ref[...].astype(jnp.float32)
    z = _layernorm(x, g_ref[...].astype(jnp.float32), b_ref[...].astype(jnp.float32))
    h = jnp.maximum(_mm(z, w1_ref, b1_ref), 0.0)
    # TODO(synk): dropout omitted (eval mode / identity).
    o_ref[...] = _mm(h, w2_ref, b2_ref).astype(o_ref.dtype)


# ------------------- kernel 2a: edge-softmax partial stats -------------------
# grid = (num_tiles,), edge axis "parallel".  Light sweep: LayerNorm + q|k
# projection only, writes per-tile masked (max, exp-sum) of shape [1,1,H].
def attn_stats_kernel(e_ref, x_ref, g1_ref, be1_ref, wqk_ref, bqk_ref, s_ref,
                      m_ref, l_ref):
    T, D = x_ref.shape
    x = x_ref[...].astype(jnp.float32)
    xn = _layernorm(x, g1_ref[...].astype(jnp.float32),
                    be1_ref[...].astype(jnp.float32))
    qk = _mm(xn, wqk_ref, bqk_ref)                              # [T, 2D]: q|k
    # per-head q.k sums via one small matmul; 1/sqrt(head_dim) folded into S
    logits = jnp.dot(qk[:, 0:D] * qk[:, D:2 * D], s_ref[...],
                     preferred_element_type=jnp.float32)        # [T, H]
    row = pl.program_id(0) * T + lax.broadcasted_iota(jnp.int32, (T, 1), 0)
    lm = jnp.where(row < e_ref[0], logits, NEG)                 # mask padded rows
    m = jnp.max(lm, axis=0, keepdims=True)                      # [1, H]
    l = jnp.sum(jnp.exp(lm - m), axis=0, keepdims=True)         # [1, H]
    m_ref[...] = m[None]
    l_ref[...] = l[None]


# -------------------- kernel 2b: EdgeAttention apply pass --------------------
# grid = (num_tiles,), edge axis "parallel".  Takes exact global (m, 1/l) as
# tiny resident inputs; does the full gated update + out_proj + FF block.
def attn_apply_kernel(e_ref, x_ref,
                      g1_ref, be1_ref,
                      w4_ref, b4_ref,           # fused lane-aligned [D,4D]: q|k|v|self
                      whh_ref, bhh_ref,         # separate [D,D] hh projection
                      s_ref, st_ref,            # per-head reduce [D,H] / broadcast [H,D]
                      m_ref, il_ref,            # global softmax max / reciprocal sum [1,H]
                      wih_ref, bih_ref, wout_ref, bout_ref,
                      g2_ref, be2_ref,
                      wf1_ref, bf1_ref, wf2_ref, bf2_ref,
                      o_ref):
    T, D = x_ref.shape
    x = x_ref[...].astype(jnp.float32)
    xn = _layernorm(x, g1_ref[...].astype(jnp.float32),
                    be1_ref[...].astype(jnp.float32))

    p4 = _mm(xn, w4_ref, b4_ref)                                # [T, 4D] f32
    hh = _mm(xn, whh_ref, bhh_ref)                              # [T, D]  lin_hh(xn)+b
    q, k = p4[:, 0:D], p4[:, D:2 * D]
    v, self_t = p4[:, 2 * D:3 * D], p4[:, 3 * D:4 * D]

    logits = jnp.dot(q * k, s_ref[...],
                     preferred_element_type=jnp.float32)        # [T, H], scale folded
    alpha = jnp.exp(logits - m_ref[...]) * il_ref[...]          # exact softmax over edges
    # TODO(synk): attn_drop omitted (eval mode / identity).
    update = v * jnp.dot(alpha, st_ref[...],
                         preferred_element_type=jnp.float32)    # per-head broadcast

    gate = jax.nn.sigmoid(_mm(update, wih_ref, bih_ref) + hh)
    update = update + gate * (self_t - update)
    y = x + _mm(update, wout_ref, bout_ref)                     # residual 1
    # TODO(synk): proj_drop omitted (eval mode / identity).

    z = _layernorm(y, g2_ref[...].astype(jnp.float32),
                   be2_ref[...].astype(jnp.float32))
    h = jnp.maximum(_mm(z, wf1_ref, bf1_ref), 0.0)
    out = y + _mm(h, wf2_ref, bf2_ref)                          # residual 2

    # Zero padded rows so only well-defined data travels to the next layer.
    row = pl.program_id(0) * T + lax.broadcasted_iota(jnp.int32, (T, 1), 0)
    o_ref[...] = jnp.where(row < e_ref[0], out, 0.0).astype(o_ref.dtype)


# ------------------------------ host wrappers -------------------------------
def _resident(arr):
    """Full-array BlockSpec whose index_map ignores the grid -> stays VMEM-resident."""
    nd = arr.ndim
    return pl.BlockSpec(arr.shape, lambda *_: (0,) * nd)


def run_ln_mlp(x, p, tile_e):
    E_pad, D2 = x.shape
    D = p["w2"].shape[1]
    dt = x.dtype
    weights = (p["gamma"], p["beta"], p["w1"], p["b1"], p["w2"], p["b2"])
    itm = jnp.dtype(dt).itemsize
    cost = pl.CostEstimate(
        flops=int(2 * E_pad * (D2 * 4 * D + 4 * D * D)),
        transcendentals=int(E_pad),
        bytes_accessed=int(itm * (E_pad * (D2 + D) + D2 * 4 * D + 4 * D * D + 10 * D)))
    return pl.pallas_call(
        ln_mlp_kernel,
        out_shape=jax.ShapeDtypeStruct((E_pad, D), dt),
        grid_spec=pltpu.PrefetchScalarGridSpec(
            num_scalar_prefetch=0,
            grid=(E_pad // tile_e,),
            in_specs=[pl.BlockSpec((tile_e, D2), lambda i: (i, 0))]
                     + [_resident(w) for w in weights],
            out_specs=pl.BlockSpec((tile_e, D), lambda i: (i, 0)),
        ),
        compiler_params=pltpu.CompilerParams(
            dimension_semantics=("parallel",),
            vmem_limit_bytes=VMEM_LIMIT),
        cost_estimate=cost,
    )(x, *weights)


def run_edge_attention(x, lp, e_arr, tile_e):
    E_pad, D = x.shape
    dt = x.dtype
    nt = E_pad // tile_e
    H = lp["S"].shape[1]

    # ---- call 1: per-tile softmax statistics (stats-only light sweep) ----
    stat_weights = (lp["g1"], lp["be1"], lp["wqk"], lp["bqk"], lp["S"])
    m_part, l_part = pl.pallas_call(
        attn_stats_kernel,
        out_shape=(jax.ShapeDtypeStruct((nt, 1, H), jnp.float32),
                   jax.ShapeDtypeStruct((nt, 1, H), jnp.float32)),
        grid_spec=pltpu.PrefetchScalarGridSpec(
            num_scalar_prefetch=1,
            grid=(nt,),
            in_specs=[pl.BlockSpec((tile_e, D), lambda i, e: (i, 0))]
                     + [_resident(w) for w in stat_weights],
            out_specs=[pl.BlockSpec((1, 1, H), lambda i, e: (i, 0, 0)),
                       pl.BlockSpec((1, 1, H), lambda i, e: (i, 0, 0))],
        ),
        compiler_params=pltpu.CompilerParams(
            dimension_semantics=("parallel",),
            vmem_limit_bytes=VMEM_LIMIT),
    )(e_arr, x, *stat_weights)

    # Tiny cross-tile reduce (plain XLA): exact global per-head max / 1/exp-sum.
    m_part = m_part[:, 0, :]
    l_part = l_part[:, 0, :]
    m_glob = jnp.max(m_part, axis=0, keepdims=True)                         # [1,H]
    l_glob = jnp.sum(l_part * jnp.exp(m_part - m_glob), axis=0, keepdims=True)
    inv_l = 1.0 / l_glob                                                    # [1,H]

    # ---- call 2: apply exact softmax + gated update + out_proj + FF ----
    apply_weights = (lp["g1"], lp["be1"], lp["w4"], lp["b4"],
                     lp["whh"], lp["bhh"], lp["S"], lp["St"], m_glob, inv_l,
                     lp["wih"], lp["bih"], lp["wout"], lp["bout"],
                     lp["g2"], lp["be2"],
                     lp["wf1"], lp["bf1"], lp["wf2"], lp["bf2"])
    itm = jnp.dtype(dt).itemsize
    cost = pl.CostEstimate(
        flops=int(2 * E_pad * D * D * 14),
        transcendentals=int(E_pad * (H + 2 * D + 4)),
        bytes_accessed=int(itm * (2 * E_pad * D + 16 * D * D)))
    return pl.pallas_call(
        attn_apply_kernel,
        out_shape=jax.ShapeDtypeStruct((E_pad, D), dt),
        grid_spec=pltpu.PrefetchScalarGridSpec(
            num_scalar_prefetch=1,
            grid=(nt,),
            in_specs=[pl.BlockSpec((tile_e, D), lambda i, e: (i, 0))]
                     + [_resident(w) for w in apply_weights],
            out_specs=pl.BlockSpec((tile_e, D), lambda i, e: (i, 0)),
        ),
        compiler_params=pltpu.CompilerParams(
            dimension_semantics=("parallel",),
            vmem_limit_bytes=VMEM_LIMIT),
        cost_estimate=cost,
    )(e_arr, x, *apply_weights)


# --------------- one-time parameter preparation (no per-forward work) --------------
def prepare_params(p0, layer_params, num_heads, dtype):
    D = p0["w2"].shape[1]
    hd = D // num_heads
    head_of_dim = jnp.arange(D, dtype=jnp.int32) // hd
    onehot = (head_of_dim[:, None] ==
              jnp.arange(num_heads, dtype=jnp.int32)[None, :]).astype(jnp.float32)
    S = onehot / (float(hd) ** 0.5)          # [D,H] per-head reduce, 1/sqrt(hd) folded in
    St = jnp.transpose(onehot)               # [H,D] per-head broadcast

    prep0 = {k: v.astype(dtype) for k, v in p0.items()}
    prep_layers = []
    for lp in layer_params:
        d = {k: lp[k].astype(dtype) for k in
             ("g1", "be1", "whh", "bhh", "wih", "bih", "wout", "bout",
              "g2", "be2", "wf1", "bf1", "wf2", "bf2")}
        d["w4"] = jnp.concatenate(
            [lp["wq"], lp["wk"], lp["wv"], lp["wself"]], axis=1).astype(dtype)
        d["b4"] = jnp.concatenate(
            [lp["bq"], lp["bk"], lp["bv"], lp["bself"]], axis=1).astype(dtype)
        d["wqk"] = d["w4"][:, :2 * D]
        d["bqk"] = d["b4"][:, :2 * D]
        d["S"] = S
        d["St"] = St
        prep_layers.append(d)
    return prep0, prep_layers


@functools.partial(jax.jit, static_argnames=("tile_e",))
def _forward_padded(x, e_arr, prep0, prep_layers, *, tile_e):
    e = run_ln_mlp(x, prep0, tile_e)
    for lp in prep_layers:
        e = run_edge_attention(e, lp, e_arr, tile_e)
    return e


def st_edge_encoder(node_embed, edge_index, v2x_mask, p0, layer_params,
                    num_heads, tile_e=2048, dtype=jnp.float32):
    # Host-side glue (gather / concat / boolean mask) -- data-dependent shape.
    node_pair = jnp.concatenate(
        (node_embed[edge_index[0]], node_embed[edge_index[1]]), axis=1)
    node_pair = node_pair[v2x_mask]
    E = int(node_pair.shape[0])

    prep0, prep_layers = prepare_params(p0, layer_params, num_heads, dtype)

    # Bucketed padding: power-of-two number of row tiles -> stable shapes, no
    # per-E recompile; the exact edge count travels as a runtime SMEM scalar.
    tile_e = max(8, (min(tile_e, pl.next_power_of_2(max(E, 8))) // 8) * 8)
    n_tiles = pl.next_power_of_2(max(1, pl.cdiv(E, tile_e)))
    E_pad = n_tiles * tile_e
    x = jnp.pad(node_pair, ((0, E_pad - E), (0, 0))).astype(dtype)
    e_arr = jnp.array([E], jnp.int32)

    out = _forward_padded(x, e_arr, prep0, prep_layers, tile_e=tile_e)
    return out[:E]


# ---------------------------- deterministic init ----------------------------
def _linear(key, d_in, d_out, scale=0.02):
    return (scale * jax.random.normal(key, (d_in, d_out), jnp.float32),
            jnp.zeros((1, d_out), jnp.float32))


def init_params(key, embed_dim, num_att_layers):
    D = embed_dim
    k0, k1, k2, *lkeys = jax.random.split(key, 3 + num_att_layers)

    w1, b1 = _linear(k1, 2 * D, 4 * D)
    w2, b2 = _linear(k2, 4 * D, D)
    p0 = dict(gamma=jnp.ones((1, 2 * D), jnp.float32),
              beta=jnp.zeros((1, 2 * D), jnp.float32),
              w1=w1, b1=b1, w2=w2, b2=b2)

    layer_params = []
    for lk in lkeys:
        ks = jax.random.split(lk, 9)
        wq, bq = _linear(ks[0], D, D)
        wk, bk = _linear(ks[1], D, D)
        wv, bv = _linear(ks[2], D, D)
        wself, bself = _linear(ks[3], D, D)
        wih, bih = _linear(ks[4], D, D)
        whh, bhh = _linear(ks[5], D, D)
        wout, bout = _linear(ks[6], D, D)
        wf1, bf1 = _linear(ks[7], D, 4 * D)
        wf2, bf2 = _linear(ks[8], 4 * D, D)
        layer_params.append(dict(
            g1=jnp.ones((1, D), jnp.float32), be1=jnp.zeros((1, D), jnp.float32),
            wq=wq, bq=bq, wk=wk, bk=bk, wv=wv, bv=bv,
            wself=wself, bself=bself, wih=wih, bih=bih, whh=whh, bhh=bhh,
            wout=wout, bout=bout,
            g2=jnp.ones((1, D), jnp.float32), be2=jnp.zeros((1, D), jnp.float32),
            wf1=wf1, bf1=bf1, wf2=wf2, bf2=bf2))
    return p0, layer_params


# ----------------------------- pure-JAX reference ---------------------------
def _ref_ln(x, g, b):
    mu = x.mean(-1, keepdims=True)
    var = ((x - mu) ** 2).mean(-1, keepdims=True)
    return (x - mu) / jnp.sqrt(var + EPS) * g + b


def ref_forward(node_embed, edge_index, v2x_mask, p0, layer_params, num_heads):
    node_pair = jnp.concatenate(
        (node_embed[edge_index[0]], node_embed[edge_index[1]]), axis=1)
    node_pair = node_pair[v2x_mask]
    z = _ref_ln(node_pair, p0["gamma"], p0["beta"])
    e = jnp.maximum(z @ p0["w1"] + p0["b1"], 0.0) @ p0["w2"] + p0["b2"]
    for lp in layer_params:
        E, D = e.shape
        hd = D // num_heads
        xn = _ref_ln(e, lp["g1"], lp["be1"])
        q = xn @ lp["wq"] + lp["bq"]
        k = xn @ lp["wk"] + lp["bk"]
        v = xn @ lp["wv"] + lp["bv"]
        logits = (q * k).reshape(E, num_heads, hd).sum(-1) / (hd ** 0.5)
        alpha = jax.nn.softmax(logits, axis=0)
        upd = (v.reshape(E, num_heads, hd) * alpha[..., None]).reshape(E, D)
        gate = jax.nn.sigmoid(upd @ lp["wih"] + lp["bih"] + xn @ lp["whh"] + lp["bhh"])
        upd = upd + gate * ((xn @ lp["wself"] + lp["bself"]) - upd)
        e = e + (upd @ lp["wout"] + lp["bout"])
        zn = _ref_ln(e, lp["g2"], lp["be2"])
        e = e + jnp.maximum(zn @ lp["wf1"] + lp["bf1"], 0.0) @ lp["wf2"] + lp["bf2"]
    return e


# ----------------------------------- main ------------------------------------
if __name__ == "__main__":
    embed_dim = 32
    num_heads = 8
    num_att_layers = 2
    n_nodes = 12
    n_edges = 22

    key = jax.random.PRNGKey(0)
    k_node, k_ei, k_par = jax.random.split(key, 3)

    node_embed = jax.random.normal(k_node, (n_nodes, embed_dim), jnp.float32)
    edge_index = jax.random.randint(k_ei, (2, n_edges), 0, n_nodes, jnp.int32)
    v2x_mask = (jnp.arange(n_edges) % 5) != 0          # 17 edges kept (exercises padding)

    p0, layer_params = init_params(k_par, embed_dim, num_att_layers)

    # f32 run with a small tile: exercises multi-tile stats+apply softmax, row
    # masking, and a fully padded trailing tile.
    out = st_edge_encoder(node_embed, edge_index, v2x_mask, p0, layer_params,
                          num_heads, tile_e=8, dtype=jnp.float32)
    out = jax.block_until_ready(out)

    ref = ref_forward(node_embed, edge_index, v2x_mask, p0, layer_params, num_heads)
    assert out.shape == ref.shape == (17, embed_dim), (out.shape, ref.shape)
    max_err = float(jnp.abs(out - ref).max())
    assert jnp.allclose(out, ref, atol=1e-3, rtol=1e-3), max_err

    # bf16 storage path (recommended on v5e/v6e): halves HBM/VMEM traffic; all
    # LayerNorm/softmax/sigmoid statistics and MXU accumulation stay f32.
    out_bf16 = st_edge_encoder(node_embed, edge_index, v2x_mask, p0, layer_params,
                               num_heads, tile_e=16, dtype=jnp.bfloat16)
    out_bf16 = jax.block_until_ready(out_bf16)
    assert out_bf16.shape == (17, embed_dim)
    assert bool(jnp.isfinite(out_bf16.astype(jnp.float32)).all())

    print("KERNEL_OK")
</pallas_src>

<mosaic_0001>
module attributes {stable_mosaic.version = 11 : i64} {
  func.func @ln_mlp_kernel(%arg0: i32, %arg1: memref<8x64xf32, #tpu.memory_space<vmem>>, %arg2: memref<1x64xf32, #tpu.memory_space<vmem>>, %arg3: memref<1x64xf32, #tpu.memory_space<vmem>>, %arg4: memref<64x128xf32, #tpu.memory_space<vmem>>, %arg5: memref<1x128xf32, #tpu.memory_space<vmem>>, %arg6: memref<128x32xf32, #tpu.memory_space<vmem>>, %arg7: memref<1x32xf32, #tpu.memory_space<vmem>>, %arg8: memref<8x32xf32, #tpu.memory_space<vmem>>) attributes {dimension_semantics = [#tpu.dimension_semantics<parallel>], iteration_bounds = array<i64: 4>, scalar_prefetch = 0 : i64, scratch_operands = 0 : i64, tpu.core_type = #tpu.core_type<tc>, window_params = [{transform_indices = @transform_0, window_bounds = array<i64: 8, 64>}, {pipeline_mode = #tpu.pipeline_mode<synchronous>, transform_indices = @transform_1, window_bounds = array<i64: 1, 64>}, {pipeline_mode = #tpu.pipeline_mode<synchronous>, transform_indices = @transform_2, window_bounds = array<i64: 1, 64>}, {pipeline_mode = #tpu.pipeline_mode<synchronous>, transform_indices = @transform_3, window_bounds = array<i64: 64, 128>}, {pipeline_mode = #tpu.pipeline_mode<synchronous>, transform_indices = @transform_4, window_bounds = array<i64: 1, 128>}, {pipeline_mode = #tpu.pipeline_mode<synchronous>, transform_indices = @transform_5, window_bounds = array<i64: 128, 32>}, {pipeline_mode = #tpu.pipeline_mode<synchronous>, transform_indices = @transform_6, window_bounds = array<i64: 1, 32>}, {transform_indices = @transform_7, window_bounds = array<i64: 8, 32>}]} {
    %c0 = arith.constant 0 : index
    %c0_0 = arith.constant 0 : index
    %0 = vector.load %arg1[%c0, %c0_0] : memref<8x64xf32, #tpu.memory_space<vmem>>, vector<8x64xf32>
    %c0_1 = arith.constant 0 : index
    %c0_2 = arith.constant 0 : index
    %1 = vector.load %arg2[%c0_1, %c0_2] : memref<1x64xf32, #tpu.memory_space<vmem>>, vector<1x64xf32>
    %c0_3 = arith.constant 0 : index
    %c0_4 = arith.constant 0 : index
    %2 = vector.load %arg3[%c0_3, %c0_4] : memref<1x64xf32, #tpu.memory_space<vmem>>, vector<1x64xf32>
    %cst = arith.constant dense<0.000000e+00> : vector<8xf32>
    %3 = vector.multi_reduction <add>, %0, %cst [1] : vector<8x64xf32> to vector<8xf32>
    %4 = vector.shape_cast %3 : vector<8xf32> to vector<8x1xf32>
    %cst_5 = arith.constant 6.400000e+01 : f32
    %5 = vector.broadcast %cst_5 : f32 to vector<8x1xf32>
    %6 = arith.divf %4, %5 : vector<8x1xf32>
    %7 = vector.broadcast %6 : vector<8x1xf32> to vector<8x64xf32>
    %8 = arith.subf %0, %7 : vector<8x64xf32>
    %9 = arith.mulf %8, %8 : vector<8x64xf32>
    %cst_6 = arith.constant dense<0.000000e+00> : vector<8xf32>
    %10 = vector.multi_reduction <add>, %9, %cst_6 [1] : vector<8x64xf32> to vector<8xf32>
    %11 = vector.shape_cast %10 : vector<8xf32> to vector<8x1xf32>
    %cst_7 = arith.constant 6.400000e+01 : f32
    %12 = vector.broadcast %cst_7 : f32 to vector<8x1xf32>
    %13 = arith.divf %11, %12 : vector<8x1xf32>
    %cst_8 = arith.constant 9.99999974E-6 : f32
    %14 = vector.broadcast %cst_8 : f32 to vector<8x1xf32>
    %15 = arith.addf %13, %14 : vector<8x1xf32>
    %16 = math.rsqrt %15 : vector<8x1xf32>
    %17 = vector.broadcast %16 : vector<8x1xf32> to vector<8x64xf32>
    %18 = arith.mulf %8, %17 : vector<8x64xf32>
    %19 = vector.broadcast %1 : vector<1x64xf32> to vector<8x64xf32>
    %20 = arith.mulf %18, %19 : vector<8x64xf32>
    %21 = vector.broadcast %2 : vector<1x64xf32> to vector<8x64xf32>
    %22 = arith.addf %20, %21 : vector<8x64xf32>
    %c0_9 = arith.constant 0 : index
    %c0_10 = arith.constant 0 : index
    %23 = vector.load %arg4[%c0_9, %c0_10] : memref<64x128xf32, #tpu.memory_space<vmem>>, vector<64x128xf32>
    %cst_11 = arith.constant dense<0.000000e+00> : vector<8x128xf32>
    %24 = tpu.matmul %22, %23, %cst_11 {dimension_numbers = #tpu.dot_dimension_numbers<[1], [0], [0], [1], [0, 0, 1, 1], [], []>} : vector<8x64xf32>, vector<64x128xf32>, vector<8x128xf32> -> vector<8x128xf32>
    %c0_12 = arith.constant 0 : index
    %c0_13 = arith.constant 0 : index
    %25 = vector.load %arg5[%c0_12, %c0_13] : memref<1x128xf32, #tpu.memory_space<vmem>>, vector<1x128xf32>
    %26 = vector.broadcast %25 : vector<1x128xf32> to vector<8x128xf32>
    %27 = arith.addf %24, %26 : vector<8x128xf32>
    %cst_14 = arith.constant 0.000000e+00 : f32
    %28 = vector.broadcast %cst_14 : f32 to vector<8x128xf32>
    %29 = arith.maximumf %27, %28 : vector<8x128xf32>
    %c0_15 = arith.constant 0 : index
    %c0_16 = arith.constant 0 : index
    %30 = vector.load %arg6[%c0_15, %c0_16] : memref<128x32xf32, #tpu.memory_space<vmem>>, vector<128x32xf32>
    %cst_17 = arith.constant dense<0.000000e+00> : vector<8x32xf32>
    %31 = tpu.matmul %29, %30, %cst_17 {dimension_numbers = #tpu.dot_dimension_numbers<[1], [0], [0], [1], [0, 0, 1, 1], [], []>} : vector<8x128xf32>, vector<128x32xf32>, vector<8x32xf32> -> vector<8x32xf32>
    %c0_18 = arith.constant 0 : index
    %c0_19 = arith.constant 0 : index
    %32 = vector.load %arg7[%c0_18, %c0_19] : memref<1x32xf32, #tpu.memory_space<vmem>>, vector<1x32xf32>
    %33 = vector.broadcast %32 : vector<1x32xf32> to vector<8x32xf32>
    %34 = arith.addf %31, %33 : vector<8x32xf32>
    %c0_20 = arith.constant 0 : index
    %c0_21 = arith.constant 0 : index
    %35 = vector.load %arg8[%c0_20, %c0_21] : memref<8x32xf32, #tpu.memory_space<vmem>>, vector<8x32xf32>
    tpu.vector_store %arg8[%c0_20, %c0_21], %34 {strides = array<i32>} : memref<8x32xf32, #tpu.memory_space<vmem>>, vector<8x32xf32>,
    return
  }
  func.func @transform_0(%arg0: i32) -> (i32, i32) {
    %c0_i32 = arith.constant 0 : i32
    %c0_i32_0 = arith.constant 0 : i32
    return %arg0, %c0_i32 : i32, i32
  }
  func.func @transform_1(%arg0: i32) -> (i32, i32) {
    %c0_i32 = arith.constant 0 : i32
    %c0_i32_0 = arith.constant 0 : i32
    %c0_i32_1 = arith.constant 0 : i32
    return %c0_i32, %c0_i32_0 : i32, i32
  }
  func.func @transform_2(%arg0: i32) -> (i32, i32) {
    %c0_i32 = arith.constant 0 : i32
    %c0_i32_0 = arith.constant 0 : i32
    %c0_i32_1 = arith.constant 0 : i32
    return %c0_i32, %c0_i32_0 : i32, i32
  }
  func.func @transform_3(%arg0: i32) -> (i32, i32) {
    %c0_i32 = arith.constant 0 : i32
    %c0_i32_0 = arith.constant 0 : i32
    %c0_i32_1 = arith.constant 0 : i32
    return %c0_i32, %c0_i32_0 : i32, i32
  }
  func.func @transform_4(%arg0: i32) -> (i32, i32) {
    %c0_i32 = arith.constant 0 : i32
    %c0_i32_0 = arith.constant 0 : i32
    %c0_i32_1 = arith.constant 0 : i32
    return %c0_i32, %c0_i32_0 : i32, i32
  }
  func.func @transform_5(%arg0: i32) -> (i32, i32) {
    %c0_i32 = arith.constant 0 : i32
    %c0_i32_0 = arith.constant 0 : i32
    %c0_i32_1 = arith.constant 0 : i32
    return %c0_i32, %c0_i32_0 : i32, i32
  }
  func.func @transform_6(%arg0: i32) -> (i32, i32) {
    %c0_i32 = arith.constant 0 : i32
    %c0_i32_0 = arith.constant 0 : i32
    %c0_i32_1 = arith.constant 0 : i32
    return %c0_i32, %c0_i32_0 : i32, i32
  }
  func.func @transform_7(%arg0: i32) -> (i32, i32) {
    %c0_i32 = arith.constant 0 : i32
    %c0_i32_0 = arith.constant 0 : i32
    return %arg0, %c0_i32 : i32, i32
  }
}

module attributes {stable_mosaic.version = 11 : i64} {
  func.func @attn_stats_kernel(%arg0: i32, %arg1: memref<1xi32, #tpu.memory_space<smem>>, %arg2: memref<8x32xf32, #tpu.memory_space<vmem>>, %arg3: memref<1x32xf32, #tpu.memory_space<vmem>>, %arg4: memref<1x32xf32, #tpu.memory_space<vmem>>, %arg5: memref<32x64xf32, #tpu.memory_space<vmem>>, %arg6: memref<1x64xf32, #tpu.memory_space<vmem>>, %arg7: memref<32x8xf32, #tpu.memory_space<vmem>>, %arg8: memref<1x1x8xf32, #tpu.memory_space<vmem>>, %arg9: memref<1x1x8xf32, #tpu.memory_space<vmem>>) attributes {dimension_semantics = [#tpu.dimension_semantics<parallel>], iteration_bounds = array<i64: 4>, scalar_prefetch = 1 : i64, scratch_operands = 0 : i64, tpu.core_type = #tpu.core_type<tc>, window_params = [{transform_indices = @transform_0, window_bounds = array<i64: 8, 32>}, {pipeline_mode = #tpu.pipeline_mode<synchronous>, transform_indices = @transform_1, window_bounds = array<i64: 1, 32>}, {pipeline_mode = #tpu.pipeline_mode<synchronous>, transform_indices = @transform_2, window_bounds = array<i64: 1, 32>}, {pipeline_mode = #tpu.pipeline_mode<synchronous>, transform_indices = @transform_3, window_bounds = array<i64: 32, 64>}, {pipeline_mode = #tpu.pipeline_mode<synchronous>, transform_indices = @transform_4, window_bounds = array<i64: 1, 64>}, {pipeline_mode = #tpu.pipeline_mode<synchronous>, transform_indices = @transform_5, window_bounds = array<i64: 32, 8>}, {transform_indices = @transform_6, window_bounds = array<i64: 1, 1, 8>}, {transform_indices = @transform_7, window_bounds = array<i64: 1, 1, 8>}]} {
    %c0 = arith.constant 0 : index
    %c0_0 = arith.constant 0 : index
    %0 = vector.load %arg2[%c0, %c0_0] : memref<8x32xf32, #tpu.memory_space<vmem>>, vector<8x32xf32>
    %c0_1 = arith.constant 0 : index
    %c0_2 = arith.constant 0 : index
    %1 = vector.load %arg3[%c0_1, %c0_2] : memref<1x32xf32, #tpu.memory_space<vmem>>, vector<1x32xf32>
    %c0_3 = arith.constant 0 : index
    %c0_4 = arith.constant 0 : index
    %2 = vector.load %arg4[%c0_3, %c0_4] : memref<1x32xf32, #tpu.memory_space<vmem>>, vector<1x32xf32>
    %cst = arith.constant dense<0.000000e+00> : vector<8xf32>
    %3 = vector.multi_reduction <add>, %0, %cst [1] : vector<8x32xf32> to vector<8xf32>
    %4 = vector.shape_cast %3 : vector<8xf32> to vector<8x1xf32>
    %cst_5 = arith.constant 3.200000e+01 : f32
    %5 = vector.broadcast %cst_5 : f32 to vector<8x1xf32>
    %6 = arith.divf %4, %5 : vector<8x1xf32>
    %7 = vector.broadcast %6 : vector<8x1xf32> to vector<8x32xf32>
    %8 = arith.subf %0, %7 : vector<8x32xf32>
    %9 = arith.mulf %8, %8 : vector<8x32xf32>
    %cst_6 = arith.constant dense<0.000000e+00> : vector<8xf32>
    %10 = vector.multi_reduction <add>, %9, %cst_6 [1] : vector<8x32xf32> to vector<8xf32>
    %11 = vector.shape_cast %10 : vector<8xf32> to vector<8x1xf32>
    %cst_7 = arith.constant 3.200000e+01 : f32
    %12 = vector.broadcast %cst_7 : f32 to vector<8x1xf32>
    %13 = arith.divf %11, %12 : vector<8x1xf32>
    %cst_8 = arith.constant 9.99999974E-6 : f32
    %14 = vector.broadcast %cst_8 : f32 to vector<8x1xf32>
    %15 = arith.addf %13, %14 : vector<8x1xf32>
    %16 = math.rsqrt %15 : vector<8x1xf32>
    %17 = vector.broadcast %16 : vector<8x1xf32> to vector<8x32xf32>
    %18 = arith.mulf %8, %17 : vector<8x32xf32>
    %19 = vector.broadcast %1 : vector<1x32xf32> to vector<8x32xf32>
    %20 = arith.mulf %18, %19 : vector<8x32xf32>
    %21 = vector.broadcast %2 : vector<1x32xf32> to vector<8x32xf32>
    %22 = arith.addf %20, %21 : vector<8x32xf32>
    %c0_9 = arith.constant 0 : index
    %c0_10 = arith.constant 0 : index
    %23 = vector.load %arg5[%c0_9, %c0_10] : memref<32x64xf32, #tpu.memory_space<vmem>>, vector<32x64xf32>
    %cst_11 = arith.constant dense<0.000000e+00> : vector<8x64xf32>
    %24 = tpu.matmul %22, %23, %cst_11 {dimension_numbers = #tpu.dot_dimension_numbers<[1], [0], [0], [1], [0, 0, 1, 1], [], []>} : vector<8x32xf32>, vector<32x64xf32>, vector<8x64xf32> -> vector<8x64xf32>
    %c0_12 = arith.constant 0 : index
    %c0_13 = arith.constant 0 : index
    %25 = vector.load %arg6[%c0_12, %c0_13] : memref<1x64xf32, #tpu.memory_space<vmem>>, vector<1x64xf32>
    %26 = vector.broadcast %25 : vector<1x64xf32> to vector<8x64xf32>
    %27 = arith.addf %24, %26 : vector<8x64xf32>
    %28 = vector.extract_strided_slice %27 {offsets = [0, 0], sizes = [8, 32], strides = [1, 1]} : vector<8x64xf32> to vector<8x32xf32>
    %29 = vector.extract_strided_slice %27 {offsets = [0, 32], sizes = [8, 32], strides = [1, 1]} : vector<8x64xf32> to vector<8x32xf32>
    %30 = arith.mulf %28, %29 : vector<8x32xf32>
    %c0_14 = arith.constant 0 : index
    %c0_15 = arith.constant 0 : index
    %31 = vector.load %arg7[%c0_14, %c0_15] : memref<32x8xf32, #tpu.memory_space<vmem>>, vector<32x8xf32>
    %cst_16 = arith.constant dense<0.000000e+00> : vector<8x8xf32>
    %32 = tpu.matmul %30, %31, %cst_16 {dimension_numbers = #tpu.dot_dimension_numbers<[1], [0], [0], [1], [0, 0, 1, 1], [], []>} : vector<8x32xf32>, vector<32x8xf32>, vector<8x8xf32> -> vector<8x8xf32>
    %c8_i32 = arith.constant 8 : i32
    %33 = arith.muli %arg0, %c8_i32 : i32
    %34 = tpu.iota {dimensions = array<i32: 0>} : vector<8x1xi32>
    %35 = vector.broadcast %33 : i32 to vector<8x1xi32>
    %36 = arith.addi %35, %34 : vector<8x1xi32>
    %c0_17 = arith.constant 0 : index
    %37 = memref.load %arg1[%c0_17] : memref<1xi32, #tpu.memory_space<smem>>
    %38 = vector.broadcast %37 : i32 to vector<8x1xi32>
    %39 = arith.cmpi slt, %36, %38 : vector<8x1xi32>
    %cst_18 = arith.constant -1.000000e+30 : f32
    %40 = vector.shape_cast %39 : vector<8x1xi1> to vector<8x1xi1>
    %41 = vector.broadcast %40 : vector<8x1xi1> to vector<8x8xi1>
    %42 = vector.broadcast %cst_18 : f32 to vector<8x8xf32>
    %43 = arith.select %41, %32, %42 : vector<8x8xi1>, vector<8x8xf32>
    %cst_19 = arith.constant dense<0xFF800000> : vector<8xf32>
    %44 = vector.multi_reduction <maximumf>, %43, %cst_19 [0] : vector<8x8xf32> to vector<8xf32>
    %45 = vector.shape_cast %44 : vector<8xf32> to vector<1x8xf32>
    %46 = vector.broadcast %45 : vector<1x8xf32> to vector<8x8xf32>
    %47 = arith.subf %43, %46 : vector<8x8xf32>
    %48 = math.exp %47 : vector<8x8xf32>
    %cst_20 = arith.constant dense<0.000000e+00> : vector<8xf32>
    %49 = vector.multi_reduction <add>, %48, %cst_20 [0] : vector<8x8xf32> to vector<8xf32>
    %50 = vector.shape_cast %49 : vector<8xf32> to vector<1x8xf32>
    %51 = vector.shape_cast %45 : vector<1x8xf32> to vector<1x1x8xf32>
    %c0_21 = arith.constant 0 : index
    %c0_22 = arith.constant 0 : index
    %c0_23 = arith.constant 0 : index
    %52 = vector.load %arg8[%c0_21, %c0_22, %c0_23] : memref<1x1x8xf32, #tpu.memory_space<vmem>>, vector<1x1x8xf32>
    tpu.vector_store %arg8[%c0_21, %c0_22, %c0_23], %51 {strides = array<i32>} : memref<1x1x8xf32, #tpu.memory_space<vmem>>, vector<1x1x8xf32>,
    %53 = vector.shape_cast %50 : vector<1x8xf32> to vector<1x1x8xf32>
    %c0_24 = arith.constant 0 : index
    %c0_25 = arith.constant 0 : index
    %c0_26 = arith.constant 0 : index
    %54 = vector.load %arg9[%c0_24, %c0_25, %c0_26] : memref<1x1x8xf32, #tpu.memory_space<vmem>>, vector<1x1x8xf32>
    tpu.vector_store %arg9[%c0_24, %c0_25, %c0_26], %53 {strides = array<i32>} : memref<1x1x8xf32, #tpu.memory_space<vmem>>, vector<1x1x8xf32>,
    return
  }
  func.func @transform_0(%arg0: i32, %arg1: memref<1xi32, #tpu.memory_space<smem>>) -> (i32, i32) {
    %c0_i32 = arith.constant 0 : i32
    %c0_i32_0 = arith.constant 0 : i32
    return %arg0, %c0_i32 : i32, i32
  }
  func.func @transform_1(%arg0: i32, %arg1: memref<1xi32, #tpu.memory_space<smem>>) -> (i32, i32) {
    %c0_i32 = arith.constant 0 : i32
    %c0_i32_0 = arith.constant 0 : i32
    %c0_i32_1 = arith.constant 0 : i32
    return %c0_i32, %c0_i32_0 : i32, i32
  }
  func.func @transform_2(%arg0: i32, %arg1: memref<1xi32, #tpu.memory_space<smem>>) -> (i32, i32) {
    %c0_i32 = arith.constant 0 : i32
    %c0_i32_0 = arith.constant 0 : i32
    %c0_i32_1 = arith.constant 0 : i32
    return %c0_i32, %c0_i32_0 : i32, i32
  }
  func.func @transform_3(%arg0: i32, %arg1: memref<1xi32, #tpu.memory_space<smem>>) -> (i32, i32) {
    %c0_i32 = arith.constant 0 : i32
    %c0_i32_0 = arith.constant 0 : i32
    %c0_i32_1 = arith.constant 0 : i32
    return %c0_i32, %c0_i32_0 : i32, i32
  }
  func.func @transform_4(%arg0: i32, %arg1: memref<1xi32, #tpu.memory_space<smem>>) -> (i32, i32) {
    %c0_i32 = arith.constant 0 : i32
    %c0_i32_0 = arith.constant 0 : i32
    %c0_i32_1 = arith.constant 0 : i32
    return %c0_i32, %c0_i32_0 : i32, i32
  }
  func.func @transform_5(%arg0: i32, %arg1: memref<1xi32, #tpu.memory_space<smem>>) -> (i32, i32) {
    %c0_i32 = arith.constant 0 : i32
    %c0_i32_0 = arith.constant 0 : i32
    %c0_i32_1 = arith.constant 0 : i32
    return %c0_i32, %c0_i32_0 : i32, i32
  }
  func.func @transform_6(%arg0: i32, %arg1: memref<1xi32, #tpu.memory_space<smem>>) -> (i32, i32, i32) {
    %c0_i32 = arith.constant 0 : i32
    %c0_i32_0 = arith.constant 0 : i32
    %c0_i32_1 = arith.constant 0 : i32
    return %arg0, %c0_i32, %c0_i32_0 : i32, i32, i32
  }
  func.func @transform_7(%arg0: i32, %arg1: memref<1xi32, #tpu.memory_space<smem>>) -> (i32, i32, i32) {
    %c0_i32 = arith.constant 0 : i32
    %c0_i32_0 = arith.constant 0 : i32
    %c0_i32_1 = arith.constant 0 : i32
    return %arg0, %c0_i32, %c0_i32_0 : i32, i32, i32
  }
}

module attributes {stable_mosaic.version = 11 : i64} {
  func.func @attn_apply_kernel(%arg0: i32, %arg1: memref<1xi32, #tpu.memory_space<smem>>, %arg2: memref<8x32xf32, #tpu.memory_space<vmem>>, %arg3: memref<1x32xf32, #tpu.memory_space<vmem>>, %arg4: memref<1x32xf32, #tpu.memory_space<vmem>>, %arg5: memref<32x128xf32, #tpu.memory_space<vmem>>, %arg6: memref<1x128xf32, #tpu.memory_space<vmem>>, %arg7: memref<32x32xf32, #tpu.memory_space<vmem>>, %arg8: memref<1x32xf32, #tpu.memory_space<vmem>>, %arg9: memref<32x8xf32, #tpu.memory_space<vmem>>, %arg10: memref<8x32xf32, #tpu.memory_space<vmem>>, %arg11: memref<1x8xf32, #tpu.memory_space<vmem>>, %arg12: memref<1x8xf32, #tpu.memory_space<vmem>>, %arg13: memref<32x32xf32, #tpu.memory_space<vmem>>, %arg14: memref<1x32xf32, #tpu.memory_space<vmem>>, %arg15: memref<32x32xf32, #tpu.memory_space<vmem>>, %arg16: memref<1x32xf32, #tpu.memory_space<vmem>>, %arg17: memref<1x32xf32, #tpu.memory_space<vmem>>, %arg18: memref<1x32xf32, #tpu.memory_space<vmem>>, %arg19: memref<32x128xf32, #tpu.memory_space<vmem>>, %arg20: memref<1x128xf32, #tpu.memory_space<vmem>>, %arg21: memref<128x32xf32, #tpu.memory_space<vmem>>, %arg22: memref<1x32xf32, #tpu.memory_space<vmem>>, %arg23: memref<8x32xf32, #tpu.memory_space<vmem>>) attributes {dimension_semantics = [#tpu.dimension_semantics<parallel>], iteration_bounds = array<i64: 4>, scalar_prefetch = 1 : i64, scratch_operands = 0 : i64, tpu.core_type = #tpu.core_type<tc>, window_params = [{transform_indices = @transform_0, window_bounds = array<i64: 8, 32>}, {pipeline_mode = #tpu.pipeline_mode<synchronous>, transform_indices = @transform_1, window_bounds = array<i64: 1, 32>}, {pipeline_mode = #tpu.pipeline_mode<synchronous>, transform_indices = @transform_2, window_bounds = array<i64: 1, 32>}, {pipeline_mode = #tpu.pipeline_mode<synchronous>, transform_indices = @transform_3, window_bounds = array<i64: 32, 128>}, {pipeline_mode = #tpu.pipeline_mode<synchronous>, transform_indices = @transform_4, window_bounds = array<i64: 1, 128>}, {pipeline_mode = #tpu.pipeline_mode<synchronous>, transform_indices = @transform_5, window_bounds = array<i64: 32, 32>}, {pipeline_mode = #tpu.pipeline_mode<synchronous>, transform_indices = @transform_6, window_bounds = array<i64: 1, 32>}, {pipeline_mode = #tpu.pipeline_mode<synchronous>, transform_indices = @transform_7, window_bounds = array<i64: 32, 8>}, {pipeline_mode = #tpu.pipeline_mode<synchronous>, transform_indices = @transform_8, window_bounds = array<i64: 8, 32>}, {pipeline_mode = #tpu.pipeline_mode<synchronous>, transform_indices = @transform_9, window_bounds = array<i64: 1, 8>}, {pipeline_mode = #tpu.pipeline_mode<synchronous>, transform_indices = @transform_10, window_bounds = array<i64: 1, 8>}, {pipeline_mode = #tpu.pipeline_mode<synchronous>, transform_indices = @transform_11, window_bounds = array<i64: 32, 32>}, {pipeline_mode = #tpu.pipeline_mode<synchronous>, transform_indices = @transform_12, window_bounds = array<i64: 1, 32>}, {pipeline_mode = #tpu.pipeline_mode<synchronous>, transform_indices = @transform_13, window_bounds = array<i64: 32, 32>}, {pipeline_mode = #tpu.pipeline_mode<synchronous>, transform_indices = @transform_14, window_bounds = array<i64: 1, 32>}, {pipeline_mode = #tpu.pipeline_mode<synchronous>, transform_indices = @transform_15, window_bounds = array<i64: 1, 32>}, {pipeline_mode = #tpu.pipeline_mode<synchronous>, transform_indices = @transform_16, window_bounds = array<i64: 1, 32>}, {pipeline_mode = #tpu.pipeline_mode<synchronous>, transform_indices = @transform_17, window_bounds = array<i64: 32, 128>}, {pipeline_mode = #tpu.pipeline_mode<synchronous>, transform_indices = @transform_18, window_bounds = array<i64: 1, 128>}, {pipeline_mode = #tpu.pipeline_mode<synchronous>, transform_indices = @transform_19, window_bounds = array<i64: 128, 32>}, {pipeline_mode = #tpu.pipeline_mode<synchronous>, transform_indices = @transform_20, window_bounds = array<i64: 1, 32>}, {transform_indices = @transform_21, window_bounds = array<i64: 8, 32>}]} {
    %c0 = arith.constant 0 : index
    %c0_0 = arith.constant 0 : index
    %0 = vector.load %arg2[%c0, %c0_0] : memref<8x32xf32, #tpu.memory_space<vmem>>, vector<8x32xf32>
    %c0_1 = arith.constant 0 : index
    %c0_2 = arith.constant 0 : index
    %1 = vector.load %arg3[%c0_1, %c0_2] : memref<1x32xf32, #tpu.memory_space<vmem>>, vector<1x32xf32>
    %c0_3 = arith.constant 0 : index
    %c0_4 = arith.constant 0 : index
    %2 = vector.load %arg4[%c0_3, %c0_4] : memref<1x32xf32, #tpu.memory_space<vmem>>, vector<1x32xf32>
    %cst = arith.constant dense<0.000000e+00> : vector<8xf32>
    %3 = vector.multi_reduction <add>, %0, %cst [1] : vector<8x32xf32> to vector<8xf32>
    %4 = vector.shape_cast %3 : vector<8xf32> to vector<8x1xf32>
    %cst_5 = arith.constant 3.200000e+01 : f32
    %5 = vector.broadcast %cst_5 : f32 to vector<8x1xf32>
    %6 = arith.divf %4, %5 : vector<8x1xf32>
    %7 = vector.broadcast %6 : vector<8x1xf32> to vector<8x32xf32>
    %8 = arith.subf %0, %7 : vector<8x32xf32>
    %9 = arith.mulf %8, %8 : vector<8x32xf32>
    %cst_6 = arith.constant dense<0.000000e+00> : vector<8xf32>
    %10 = vector.multi_reduction <add>, %9, %cst_6 [1] : vector<8x32xf32> to vector<8xf32>
    %11 = vector.shape_cast %10 : vector<8xf32> to vector<8x1xf32>
    %cst_7 = arith.constant 3.200000e+01 : f32
    %12 = vector.broadcast %cst_7 : f32 to vector<8x1xf32>
    %13 = arith.divf %11, %12 : vector<8x1xf32>
    %cst_8 = arith.constant 9.99999974E-6 : f32
    %14 = vector.broadcast %cst_8 : f32 to vector<8x1xf32>
    %15 = arith.addf %13, %14 : vector<8x1xf32>
    %16 = math.rsqrt %15 : vector<8x1xf32>
    %17 = vector.broadcast %16 : vector<8x1xf32> to vector<8x32xf32>
    %18 = arith.mulf %8, %17 : vector<8x32xf32>
    %19 = vector.broadcast %1 : vector<1x32xf32> to vector<8x32xf32>
    %20 = arith.mulf %18, %19 : vector<8x32xf32>
    %21 = vector.broadcast %2 : vector<1x32xf32> to vector<8x32xf32>
    %22 = arith.addf %20, %21 : vector<8x32xf32>
    %c0_9 = arith.constant 0 : index
    %c0_10 = arith.constant 0 : index
    %23 = vector.load %arg5[%c0_9, %c0_10] : memref<32x128xf32, #tpu.memory_space<vmem>>, vector<32x128xf32>
    %cst_11 = arith.constant dense<0.000000e+00> : vector<8x128xf32>
    %24 = tpu.matmul %22, %23, %cst_11 {dimension_numbers = #tpu.dot_dimension_numbers<[1], [0], [0], [1], [0, 0, 1, 1], [], []>} : vector<8x32xf32>, vector<32x128xf32>, vector<8x128xf32> -> vector<8x128xf32>
    %c0_12 = arith.constant 0 : index
    %c0_13 = arith.constant 0 : index
    %25 = vector.load %arg6[%c0_12, %c0_13] : memref<1x128xf32, #tpu.memory_space<vmem>>, vector<1x128xf32>
    %26 = vector.broadcast %25 : vector<1x128xf32> to vector<8x128xf32>
    %27 = arith.addf %24, %26 : vector<8x128xf32>
    %c0_14 = arith.constant 0 : index
    %c0_15 = arith.constant 0 : index
    %28 = vector.load %arg7[%c0_14, %c0_15] : memref<32x32xf32, #tpu.memory_space<vmem>>, vector<32x32xf32>
    %cst_16 = arith.constant dense<0.000000e+00> : vector<8x32xf32>
    %29 = tpu.matmul %22, %28, %cst_16 {dimension_numbers = #tpu.dot_dimension_numbers<[1], [0], [0], [1], [0, 0, 1, 1], [], []>} : vector<8x32xf32>, vector<32x32xf32>, vector<8x32xf32> -> vector<8x32xf32>
    %c0_17 = arith.constant 0 : index
    %c0_18 = arith.constant 0 : index
    %30 = vector.load %arg8[%c0_17, %c0_18] : memref<1x32xf32, #tpu.memory_space<vmem>>, vector<1x32xf32>
    %31 = vector.broadcast %30 : vector<1x32xf32> to vector<8x32xf32>
    %32 = arith.addf %29, %31 : vector<8x32xf32>
    %33 = vector.extract_strided_slice %27 {offsets = [0, 0], sizes = [8, 32], strides = [1, 1]} : vector<8x128xf32> to vector<8x32xf32>
    %34 = vector.extract_strided_slice %27 {offsets = [0, 32], sizes = [8, 32], strides = [1, 1]} : vector<8x128xf32> to vector<8x32xf32>
    %35 = vector.extract_strided_slice %27 {offsets = [0, 64], sizes = [8, 32], strides = [1, 1]} : vector<8x128xf32> to vector<8x32xf32>
    %36 = vector.extract_strided_slice %27 {offsets = [0, 96], sizes = [8, 32], strides = [1, 1]} : vector<8x128xf32> to vector<8x32xf32>
    %37 = arith.mulf %33, %34 : vector<8x32xf32>
    %c0_19 = arith.constant 0 : index
    %c0_20 = arith.constant 0 : index
    %38 = vector.load %arg9[%c0_19, %c0_20] : memref<32x8xf32, #tpu.memory_space<vmem>>, vector<32x8xf32>
    %cst_21 = arith.constant dense<0.000000e+00> : vector<8x8xf32>
    %39 = tpu.matmul %37, %38, %cst_21 {dimension_numbers = #tpu.dot_dimension_numbers<[1], [0], [0], [1], [0, 0, 1, 1], [], []>} : vector<8x32xf32>, vector<32x8xf32>, vector<8x8xf32> -> vector<8x8xf32>
    %c0_22 = arith.constant 0 : index
    %c0_23 = arith.constant 0 : index
    %40 = vector.load %arg11[%c0_22, %c0_23] : memref<1x8xf32, #tpu.memory_space<vmem>>, vector<1x8xf32>
    %41 = vector.broadcast %40 : vector<1x8xf32> to vector<8x8xf32>
    %42 = arith.subf %39, %41 : vector<8x8xf32>
    %43 = math.exp %42 : vector<8x8xf32>
    %c0_24 = arith.constant 0 : index
    %c0_25 = arith.constant 0 : index
    %44 = vector.load %arg12[%c0_24, %c0_25] : memref<1x8xf32, #tpu.memory_space<vmem>>, vector<1x8xf32>
    %45 = vector.broadcast %44 : vector<1x8xf32> to vector<8x8xf32>
    %46 = arith.mulf %43, %45 : vector<8x8xf32>
    %c0_26 = arith.constant 0 : index
    %c0_27 = arith.constant 0 : index
    %47 = vector.load %arg10[%c0_26, %c0_27] : memref<8x32xf32, #tpu.memory_space<vmem>>, vector<8x32xf32>
    %cst_28 = arith.constant dense<0.000000e+00> : vector<8x32xf32>
    %48 = tpu.matmul %46, %47, %cst_28 {dimension_numbers = #tpu.dot_dimension_numbers<[1], [0], [0], [1], [0, 0, 1, 1], [], []>} : vector<8x8xf32>, vector<8x32xf32>, vector<8x32xf32> -> vector<8x32xf32>
    %49 = arith.mulf %35, %48 : vector<8x32xf32>
    %c0_29 = arith.constant 0 : index
    %c0_30 = arith.constant 0 : index
    %50 = vector.load %arg13[%c0_29, %c0_30] : memref<32x32xf32, #tpu.memory_space<vmem>>, vector<32x32xf32>
    %cst_31 = arith.constant dense<0.000000e+00> : vector<8x32xf32>
    %51 = tpu.matmul %49, %50, %cst_31 {dimension_numbers = #tpu.dot_dimension_numbers<[1], [0], [0], [1], [0, 0, 1, 1], [], []>} : vector<8x32xf32>, vector<32x32xf32>, vector<8x32xf32> -> vector<8x32xf32>
    %c0_32 = arith.constant 0 : index
    %c0_33 = arith.constant 0 : index
    %52 = vector.load %arg14[%c0_32, %c0_33] : memref<1x32xf32, #tpu.memory_space<vmem>>, vector<1x32xf32>
    %53 = vector.broadcast %52 : vector<1x32xf32> to vector<8x32xf32>
    %54 = arith.addf %51, %53 : vector<8x32xf32>
    %55 = arith.addf %54, %32 : vector<8x32xf32>
    %56 = arith.negf %55 : vector<8x32xf32>
    %57 = math.exp %56 : vector<8x32xf32>
    %cst_34 = arith.constant 1.000000e+00 : f32
    %58 = vector.broadcast %cst_34 : f32 to vector<8x32xf32>
    %59 = arith.addf %58, %57 : vector<8x32xf32>
    %60 = arith.divf %58, %59 : vector<8x32xf32>
    %61 = arith.subf %36, %49 : vector<8x32xf32>
    %62 = arith.mulf %60, %61 : vector<8x32xf32>
    %63 = arith.addf %49, %62 : vector<8x32xf32>
    %c0_35 = arith.constant 0 : index
    %c0_36 = arith.constant 0 : index
    %64 = vector.load %arg15[%c0_35, %c0_36] : memref<32x32xf32, #tpu.memory_space<vmem>>, vector<32x32xf32>
    %cst_37 = arith.constant dense<0.000000e+00> : vector<8x32xf32>
    %65 = tpu.matmul %63, %64, %cst_37 {dimension_numbers = #tpu.dot_dimension_numbers<[1], [0], [0], [1], [0, 0, 1, 1], [], []>} : vector<8x32xf32>, vector<32x32xf32>, vector<8x32xf32> -> vector<8x32xf32>
    %c0_38 = arith.constant 0 : index
    %c0_39 = arith.constant 0 : index
    %66 = vector.load %arg16[%c0_38, %c0_39] : memref<1x32xf32, #tpu.memory_space<vmem>>, vector<1x32xf32>
    %67 = vector.broadcast %66 : vector<1x32xf32> to vector<8x32xf32>
    %68 = arith.addf %65, %67 : vector<8x32xf32>
    %69 = arith.addf %0, %68 : vector<8x32xf32>
    %c0_40 = arith.constant 0 : index
    %c0_41 = arith.constant 0 : index
    %70 = vector.load %arg17[%c0_40, %c0_41] : memref<1x32xf32, #tpu.memory_space<vmem>>, vector<1x32xf32>
    %c0_42 = arith.constant 0 : index
    %c0_43 = arith.constant 0 : index
    %71 = vector.load %arg18[%c0_42, %c0_43] : memref<1x32xf32, #tpu.memory_space<vmem>>, vector<1x32xf32>
    %cst_44 = arith.constant dense<0.000000e+00> : vector<8xf32>
    %72 = vector.multi_reduction <add>, %69, %cst_44 [1] : vector<8x32xf32> to vector<8xf32>
    %73 = vector.shape_cast %72 : vector<8xf32> to vector<8x1xf32>
    %cst_45 = arith.constant 3.200000e+01 : f32
    %74 = vector.broadcast %cst_45 : f32 to vector<8x1xf32>
    %75 = arith.divf %73, %74 : vector<8x1xf32>
    %76 = vector.broadcast %75 : vector<8x1xf32> to vector<8x32xf32>
    %77 = arith.subf %69, %76 : vector<8x32xf32>
    %78 = arith.mulf %77, %77 : vector<8x32xf32>
    %cst_46 = arith.constant dense<0.000000e+00> : vector<8xf32>
    %79 = vector.multi_reduction <add>, %78, %cst_46 [1] : vector<8x32xf32> to vector<8xf32>
    %80 = vector.shape_cast %79 : vector<8xf32> to vector<8x1xf32>
    %cst_47 = arith.constant 3.200000e+01 : f32
    %81 = vector.broadcast %cst_47 : f32 to vector<8x1xf32>
    %82 = arith.divf %80, %81 : vector<8x1xf32>
    %cst_48 = arith.constant 9.99999974E-6 : f32
    %83 = vector.broadcast %cst_48 : f32 to vector<8x1xf32>
    %84 = arith.addf %82, %83 : vector<8x1xf32>
    %85 = math.rsqrt %84 : vector<8x1xf32>
    %86 = vector.broadcast %85 : vector<8x1xf32> to vector<8x32xf32>
    %87 = arith.mulf %77, %86 : vector<8x32xf32>
    %88 = vector.broadcast %70 : vector<1x32xf32> to vector<8x32xf32>
    %89 = arith.mulf %87, %88 : vector<8x32xf32>
    %90 = vector.broadcast %71 : vector<1x32xf32> to vector<8x32xf32>
    %91 = arith.addf %89, %90 : vector<8x32xf32>
    %c0_49 = arith.constant 0 : index
    %c0_50 = arith.constant 0 : index
    %92 = vector.load %arg19[%c0_49, %c0_50] : memref<32x128xf32, #tpu.memory_space<vmem>>, vector<32x128xf32>
    %cst_51 = arith.constant dense<0.000000e+00> : vector<8x128xf32>
    %93 = tpu.matmul %91, %92, %cst_51 {dimension_numbers = #tpu.dot_dimension_numbers<[1], [0], [0], [1], [0, 0, 1, 1], [], []>} : vector<8x32xf32>, vector<32x128xf32>, vector<8x128xf32> -> vector<8x128xf32>
    %c0_52 = arith.constant 0 : index
    %c0_53 = arith.constant 0 : index
    %94 = vector.load %arg20[%c0_52, %c0_53] : memref<1x128xf32, #tpu.memory_space<vmem>>, vector<1x128xf32>
    %95 = vector.broadcast %94 : vector<1x128xf32> to vector<8x128xf32>
    %96 = arith.addf %93, %95 : vector<8x128xf32>
    %cst_54 = arith.constant 0.000000e+00 : f32
    %97 = vector.broadcast %cst_54 : f32 to vector<8x128xf32>
    %98 = arith.maximumf %96, %97 : vector<8x128xf32>
    %c0_55 = arith.constant 0 : index
    %c0_56 = arith.constant 0 : index
    %99 = vector.load %arg21[%c0_55, %c0_56] : memref<128x32xf32, #tpu.memory_space<vmem>>, vector<128x32xf32>
    %cst_57 = arith.constant dense<0.000000e+00> : vector<8x32xf32>
    %100 = tpu.matmul %98, %99, %cst_57 {dimension_numbers = #tpu.dot_dimension_numbers<[1], [0], [0], [1], [0, 0, 1, 1], [], []>} : vector<8x128xf32>, vector<128x32xf32>, vector<8x32xf32> -> vector<8x32xf32>
    %c0_58 = arith.constant 0 : index
    %c0_59 = arith.constant 0 : index
    %101 = vector.load %arg22[%c0_58, %c0_59] : memref<1x32xf32, #tpu.memory_space<vmem>>, vector<1x32xf32>
    %102 = vector.broadcast %101 : vector<1x32xf32> to vector<8x32xf32>
    %103 = arith.addf %100, %102 : vector<8x32xf32>
    %104 = arith.addf %69, %103 : vector<8x32xf32>
    %c8_i32 = arith.constant 8 : i32
    %105 = arith.muli %arg0, %c8_i32 : i32
    %106 = tpu.iota {dimensions = array<i32: 0>} : vector<8x1xi32>
    %107 = vector.broadcast %105 : i32 to vector<8x1xi32>
    %108 = arith.addi %107, %106 : vector<8x1xi32>
    %c0_60 = arith.constant 0 : index
    %109 = memref.load %arg1[%c0_60] : memref<1xi32, #tpu.memory_space<smem>>
    %110 = vector.broadcast %109 : i32 to vector<8x1xi32>
    %111 = arith.cmpi slt, %108, %110 : vector<8x1xi32>
    %cst_61 = arith.constant 0.000000e+00 : f32
    %112 = vector.shape_cast %111 : vector<8x1xi1> to vector<8x1xi1>
    %113 = vector.broadcast %112 : vector<8x1xi1> to vector<8x32xi1>
    %114 = vector.broadcast %cst_61 : f32 to vector<8x32xf32>
    %115 = arith.select %113, %104, %114 : vector<8x32xi1>, vector<8x32xf32>
    %c0_62 = arith.constant 0 : index
    %c0_63 = arith.constant 0 : index
    %116 = vector.load %arg23[%c0_62, %c0_63] : memref<8x32xf32, #tpu.memory_space<vmem>>, vector<8x32xf32>
    tpu.vector_store %arg23[%c0_62, %c0_63], %115 {strides = array<i32>} : memref<8x32xf32, #tpu.memory_space<vmem>>, vector<8x32xf32>,
    return
  }
  func.func @transform_0(%arg0: i32, %arg1: memref<1xi32, #tpu.memory_space<smem>>) -> (i32, i32) {
    %c0_i32 = arith.constant 0 : i32
    %c0_i32_0 = arith.constant 0 : i32
    return %arg0, %c0_i32 : i32, i32
  }
  func.func @transform_1(%arg0: i32, %arg1: memref<1xi32, #tpu.memory_space<smem>>) -> (i32, i32) {
    %c0_i32 = arith.constant 0 : i32
    %c0_i32_0 = arith.constant 0 : i32
    %c0_i32_1 = arith.constant 0 : i32
    return %c0_i32, %c0_i32_0 : i32, i32
  }
  func.func @transform_2(%arg0: i32, %arg1: memref<1xi32, #tpu.memory_space<smem>>) -> (i32, i32) {
    %c0_i32 = arith.constant 0 : i32
    %c0_i32_0 = arith.constant 0 : i32
    %c0_i32_1 = arith.constant 0 : i32
    return %c0_i32, %c0_i32_0 : i32, i32
  }
  func.func @transform_3(%arg0: i32, %arg1: memref<1xi32, #tpu.memory_space<smem>>) -> (i32, i32) {
    %c0_i32 = arith.constant 0 : i32
    %c0_i32_0 = arith.constant 0 : i32
    %c0_i32_1 = arith.constant 0 : i32
    return %c0_i32, %c0_i32_0 : i32, i32
  }
  func.func @transform_4(%arg0: i32, %arg1: memref<1xi32, #tpu.memory_space<smem>>) -> (i32, i32) {
    %c0_i32 = arith.constant 0 : i32
    %c0_i32_0 = arith.constant 0 : i32
    %c0_i32_1 = arith.constant 0 : i32
    return %c0_i32, %c0_i32_0 : i32, i32
  }
  func.func @transform_5(%arg0: i32, %arg1: memref<1xi32, #tpu.memory_space<smem>>) -> (i32, i32) {
    %c0_i32 = arith.constant 0 : i32
    %c0_i32_0 = arith.constant 0 : i32
    %c0_i32_1 = arith.constant 0 : i32
    return %c0_i32, %c0_i32_0 : i32, i32
  }
  func.func @transform_6(%arg0: i32, %arg1: memref<1xi32, #tpu.memory_space<smem>>) -> (i32, i32) {
    %c0_i32 = arith.constant 0 : i32
    %c0_i32_0 = arith.constant 0 : i32
    %c0_i32_1 = arith.constant 0 : i32
    return %c0_i32, %c0_i32_0 : i32, i32
  }
  func.func @transform_7(%arg0: i32, %arg1: memref<1xi32, #tpu.memory_space<smem>>) -> (i32, i32) {
    %c0_i32 = arith.constant 0 : i32
    %c0_i32_0 = arith.constant 0 : i32
    %c0_i32_1 = arith.constant 0 : i32
    return %c0_i32, %c0_i32_0 : i32, i32
  }
  func.func @transform_8(%arg0: i32, %arg1: memref<1xi32, #tpu.memory_space<smem>>) -> (i32, i32) {
    %c0_i32 = arith.constant 0 : i32
    %c0_i32_0 = arith.constant 0 : i32
    %c0_i32_1 = arith.constant 0 : i32
    return %c0_i32, %c0_i32_0 : i32, i32
  }
  func.func @transform_9(%arg0: i32, %arg1: memref<1xi32, #tpu.memory_space<smem>>) -> (i32, i32) {
    %c0_i32 = arith.constant 0 : i32
    %c0_i32_0 = arith.constant 0 : i32
    %c0_i32_1 = arith.constant 0 : i32
    return %c0_i32, %c0_i32_0 : i32, i32
  }
  func.func @transform_10(%arg0: i32, %arg1: memref<1xi32, #tpu.memory_space<smem>>) -> (i32, i32) {
    %c0_i32 = arith.constant 0 : i32
    %c0_i32_0 = arith.constant 0 : i32
    %c0_i32_1 = arith.constant 0 : i32
    return %c0_i32, %c0_i32_0 : i32, i32
  }
  func.func @transform_11(%arg0: i32, %arg1: memref<1xi32, #tpu.memory_space<smem>>) -> (i32, i32) {
    %c0_i32 = arith.constant 0 : i32
    %c0_i32_0 = arith.constant 0 : i32
    %c0_i32_1 = arith.constant 0 : i32
    return %c0_i32, %c0_i32_0 : i32, i32
  }
  func.func @transform_12(%arg0: i32, %arg1: memref<1xi32, #tpu.memory_space<smem>>) -> (i32, i32) {
    %c0_i32 = arith.constant 0 : i32
    %c0_i32_0 = arith.constant 0 : i32
    %c0_i32_1 = arith.constant 0 : i32
    return %c0_i32, %c0_i32_0 : i32, i32
  }
  func.func @transform_13(%arg0: i32, %arg1: memref<1xi32, #tpu.memory_space<smem>>) -> (i32, i32) {
    %c0_i32 = arith.constant 0 : i32
    %c0_i32_0 = arith.constant 0 : i32
    %c0_i32_1 = arith.constant 0 : i32
    return %c0_i32, %c0_i32_0 : i32, i32
  }
  func.func @transform_14(%arg0: i32, %arg1: memref<1xi32, #tpu.memory_space<smem>>) -> (i32, i32) {
    %c0_i32 = arith.constant 0 : i32
    %c0_i32_0 = arith.constant 0 : i32
    %c0_i32_1 = arith.constant 0 : i32
    return %c0_i32, %c0_i32_0 : i32, i32
  }
  func.func @transform_15(%arg0: i32, %arg1: memref<1xi32, #tpu.memory_space<smem>>) -> (i32, i32) {
    %c0_i32 = arith.constant 0 : i32
    %c0_i32_0 = arith.constant 0 : i32
    %c0_i32_1 = arith.constant 0 : i32
    return %c0_i32, %c0_i32_0 : i32, i32
  }
  func.func @transform_16(%arg0: i32, %arg1: memref<1xi32, #tpu.memory_space<smem>>) -> (i32, i32) {
    %c0_i32 = arith.constant 0 : i32
    %c0_i32_0 = arith.constant 0 : i32
    %c0_i32_1 = arith.constant 0 : i32
    return %c0_i32, %c0_i32_0 : i32, i32
  }
  func.func @transform_17(%arg0: i32, %arg1: memref<1xi32, #tpu.memory_space<smem>>) -> (i32, i32) {
    %c0_i32 = arith.constant 0 : i32
    %c0_i32_0 = arith.constant 0 : i32
    %c0_i32_1 = arith.constant 0 : i32
    return %c0_i32, %c0_i32_0 : i32, i32
  }
  func.func @transform_18(%arg0: i32, %arg1: memref<1xi32, #tpu.memory_space<smem>>) -> (i32, i32) {
    %c0_i32 = arith.constant 0 : i32
    %c0_i32_0 = arith.constant 0 : i32
    %c0_i32_1 = arith.constant 0 : i32
    return %c0_i32, %c0_i32_0 : i32, i32
  }
  func.func @transform_19(%arg0: i32, %arg1: memref<1xi32, #tpu.memory_space<smem>>) -> (i32, i32) {
    %c0_i32 = arith.constant 0 : i32
    %c0_i32_0 = arith.constant 0 : i32
    %c0_i32_1 = arith.constant 0 : i32
    return %c0_i32, %c0_i32_0 : i32, i32
  }
  func.func @transform_20(%arg0: i32, %arg1: memref<1xi32, #tpu.memory_space<smem>>) -> (i32, i32) {
    %c0_i32 = arith.constant 0 : i32
    %c0_i32_0 = arith.constant 0 : i32
    %c0_i32_1 = arith.constant 0 : i32
    return %c0_i32, %c0_i32_0 : i32, i32
  }
  func.func @transform_21(%arg0: i32, %arg1: memref<1xi32, #tpu.memory_space<smem>>) -> (i32, i32) {
    %c0_i32 = arith.constant 0 : i32
    %c0_i32_0 = arith.constant 0 : i32
    return %arg0, %c0_i32 : i32, i32
  }
}

module attributes {stable_mosaic.version = 11 : i64} {
  func.func @attn_apply_kernel(%arg0: i32, %arg1: memref<1xi32, #tpu.memory_space<smem>>, %arg2: memref<8x32xf32, #tpu.memory_space<vmem>>, %arg3: memref<1x32xf32, #tpu.memory_space<vmem>>, %arg4: memref<1x32xf32, #tpu.memory_space<vmem>>, %arg5: memref<32x128xf32, #tpu.memory_space<vmem>>, %arg6: memref<1x128xf32, #tpu.memory_space<vmem>>, %arg7: memref<32x32xf32, #tpu.memory_space<vmem>>, %arg8: memref<1x32xf32, #tpu.memory_space<vmem>>, %arg9: memref<32x8xf32, #tpu.memory_space<vmem>>, %arg10: memref<8x32xf32, #tpu.memory_space<vmem>>, %arg11: memref<1x8xf32, #tpu.memory_space<vmem>>, %arg12: memref<1x8xf32, #tpu.memory_space<vmem>>, %arg13: memref<32x32xf32, #tpu.memory_space<vmem>>, %arg14: memref<1x32xf32, #tpu.memory_space<vmem>>, %arg15: memref<32x32xf32, #tpu.memory_space<vmem>>, %arg16: memref<1x32xf32, #tpu.memory_space<vmem>>, %arg17: memref<1x32xf32, #tpu.memory_space<vmem>>, %arg18: memref<1x32xf32, #tpu.memory_space<vmem>>, %arg19: memref<32x128xf32, #tpu.memory_space<vmem>>, %arg20: memref<1x128xf32, #tpu.memory_space<vmem>>, %arg21: memref<128x32xf32, #tpu.memory_space<vmem>>, %arg22: memref<1x32xf32, #tpu.memory_space<vmem>>, %arg23: memref<8x32xf32, #tpu.memory_space<vmem>>) attributes {dimension_semantics = [#tpu.dimension_semantics<parallel>], iteration_bounds = array<i64: 4>, scalar_prefetch = 1 : i64, scratch_operands = 0 : i64, tpu.core_type = #tpu.core_type<tc>, window_params = [{transform_indices = @transform_0, window_bounds = array<i64: 8, 32>}, {pipeline_mode = #tpu.pipeline_mode<synchronous>, transform_indices = @transform_1, window_bounds = array<i64: 1, 32>}, {pipeline_mode = #tpu.pipeline_mode<synchronous>, transform_indices = @transform_2, window_bounds = array<i64: 1, 32>}, {pipeline_mode = #tpu.pipeline_mode<synchronous>, transform_indices = @transform_3, window_bounds = array<i64: 32, 128>}, {pipeline_mode = #tpu.pipeline_mode<synchronous>, transform_indices = @transform_4, window_bounds = array<i64: 1, 128>}, {pipeline_mode = #tpu.pipeline_mode<synchronous>, transform_indices = @transform_5, window_bounds = array<i64: 32, 32>}, {pipeline_mode = #tpu.pipeline_mode<synchronous>, transform_indices = @transform_6, window_bounds = array<i64: 1, 32>}, {pipeline_mode = #tpu.pipeline_mode<synchronous>, transform_indices = @transform_7, window_bounds = array<i64: 32, 8>}, {pipeline_mode = #tpu.pipeline_mode<synchronous>, transform_indices = @transform_8, window_bounds = array<i64: 8, 32>}, {pipeline_mode = #tpu.pipeline_mode<synchronous>, transform_indices = @transform_9, window_bounds = array<i64: 1, 8>}, {pipeline_mode = #tpu.pipeline_mode<synchronous>, transform_indices = @transform_10, window_bounds = array<i64: 1, 8>}, {pipeline_mode = #tpu.pipeline_mode<synchronous>, transform_indices = @transform_11, window_bounds = array<i64: 32, 32>}, {pipeline_mode = #tpu.pipeline_mode<synchronous>, transform_indices = @transform_12, window_bounds = array<i64: 1, 32>}, {pipeline_mode = #tpu.pipeline_mode<synchronous>, transform_indices = @transform_13, window_bounds = array<i64: 32, 32>}, {pipeline_mode = #tpu.pipeline_mode<synchronous>, transform_indices = @transform_14, window_bounds = array<i64: 1, 32>}, {pipeline_mode = #tpu.pipeline_mode<synchronous>, transform_indices = @transform_15, window_bounds = array<i64: 1, 32>}, {pipeline_mode = #tpu.pipeline_mode<synchronous>, transform_indices = @transform_16, window_bounds = array<i64: 1, 32>}, {pipeline_mode = #tpu.pipeline_mode<synchronous>, transform_indices = @transform_17, window_bounds = array<i64: 32, 128>}, {pipeline_mode = #tpu.pipeline_mode<synchronous>, transform_indices = @transform_18, window_bounds = array<i64: 1, 128>}, {pipeline_mode = #tpu.pipeline_mode<synchronous>, transform_indices = @transform_19, window_bounds = array<i64: 128, 32>}, {pipeline_mode = #tpu.pipeline_mode<synchronous>, transform_indices = @transform_20, window_bounds = array<i64: 1, 32>}, {transform_indices = @transform_21, window_bounds = array<i64: 8, 32>}]} {
    %c0 = arith.constant 0 : index
    %c0_0 = arith.constant 0 : index
    %0 = vector.load %arg2[%c0, %c0_0] : memref<8x32xf32, #tpu.memory_space<vmem>>, vector<8x32xf32>
    %c0_1 = arith.constant 0 : index
    %c0_2 = arith.constant 0 : index
    %1 = vector.load %arg3[%c0_1, %c0_2] : memref<1x32xf32, #tpu.memory_space<vmem>>, vector<1x32xf32>
    %c0_3 = arith.constant 0 : index
    %c0_4 = arith.constant 0 : index
    %2 = vector.load %arg4[%c0_3, %c0_4] : memref<1x32xf32, #tpu.memory_space<vmem>>, vector<1x32xf32>
    %cst = arith.constant dense<0.000000e+00> : vector<8xf32>
    %3 = vector.multi_reduction <add>, %0, %cst [1] : vector<8x32xf32> to vector<8xf32>
    %4 = vector.shape_cast %3 : vector<8xf32> to vector<8x1xf32>
    %cst_5 = arith.constant 3.200000e+01 : f32
    %5 = vector.broadcast %cst_5 : f32 to vector<8x1xf32>
    %6 = arith.divf %4, %5 : vector<8x1xf32>
    %7 = vector.broadcast %6 : vector<8x1xf32> to vector<8x32xf32>
    %8 = arith.subf %0, %7 : vector<8x32xf32>
    %9 = arith.mulf %8, %8 : vector<8x32xf32>
    %cst_6 = arith.constant dense<0.000000e+00> : vector<8xf32>
    %10 = vector.multi_reduction <add>, %9, %cst_6 [1] : vector<8x32xf32> to vector<8xf32>
    %11 = vector.shape_cast %10 : vector<8xf32> to vector<8x1xf32>
    %cst_7 = arith.constant 3.200000e+01 : f32
    %12 = vector.broadcast %cst_7 : f32 to vector<8x1xf32>
    %13 = arith.divf %11, %12 : vector<8x1xf32>
    %cst_8 = arith.constant 9.99999974E-6 : f32
    %14 = vector.broadcast %cst_8 : f32 to vector<8x1xf32>
    %15 = arith.addf %13, %14 : vector<8x1xf32>
    %16 = math.rsqrt %15 : vector<8x1xf32>
    %17 = vector.broadcast %16 : vector<8x1xf32> to vector<8x32xf32>
    %18 = arith.mulf %8, %17 : vector<8x32xf32>
    %19 = vector.broadcast %1 : vector<1x32xf32> to vector<8x32xf32>
    %20 = arith.mulf %18, %19 : vector<8x32xf32>
    %21 = vector.broadcast %2 : vector<1x32xf32> to vector<8x32xf32>
    %22 = arith.addf %20, %21 : vector<8x32xf32>
    %c0_9 = arith.constant 0 : index
    %c0_10 = arith.constant 0 : index
    %23 = vector.load %arg5[%c0_9, %c0_10] : memref<32x128xf32, #tpu.memory_space<vmem>>, vector<32x128xf32>
    %cst_11 = arith.constant dense<0.000000e+00> : vector<8x128xf32>
    %24 = tpu.matmul %22, %23, %cst_11 {dimension_numbers = #tpu.dot_dimension_numbers<[1], [0], [0], [1], [0, 0, 1, 1], [], []>} : vector<8x32xf32>, vector<32x128xf32>, vector<8x128xf32> -> vector<8x128xf32>
    %c0_12 = arith.constant 0 : index
    %c0_13 = arith.constant 0 : index
    %25 = vector.load %arg6[%c0_12, %c0_13] : memref<1x128xf32, #tpu.memory_space<vmem>>, vector<1x128xf32>
    %26 = vector.broadcast %25 : vector<1x128xf32> to vector<8x128xf32>
    %27 = arith.addf %24, %26 : vector<8x128xf32>
    %c0_14 = arith.constant 0 : index
    %c0_15 = arith.constant 0 : index
    %28 = vector.load %arg7[%c0_14, %c0_15] : memref<32x32xf32, #tpu.memory_space<vmem>>, vector<32x32xf32>
    %cst_16 = arith.constant dense<0.000000e+00> : vector<8x32xf32>
    %29 = tpu.matmul %22, %28, %cst_16 {dimension_numbers = #tpu.dot_dimension_numbers<[1], [0], [0], [1], [0, 0, 1, 1], [], []>} : vector<8x32xf32>, vector<32x32xf32>, vector<8x32xf32> -> vector<8x32xf32>
    %c0_17 = arith.constant 0 : index
    %c0_18 = arith.constant 0 : index
    %30 = vector.load %arg8[%c0_17, %c0_18] : memref<1x32xf32, #tpu.memory_space<vmem>>, vector<1x32xf32>
    %31 = vector.broadcast %30 : vector<1x32xf32> to vector<8x32xf32>
    %32 = arith.addf %29, %31 : vector<8x32xf32>
    %33 = vector.extract_strided_slice %27 {offsets = [0, 0], sizes = [8, 32], strides = [1, 1]} : vector<8x128xf32> to vector<8x32xf32>
    %34 = vector.extract_strided_slice %27 {offsets = [0, 32], sizes = [8, 32], strides = [1, 1]} : vector<8x128xf32> to vector<8x32xf32>
    %35 = vector.extract_strided_slice %27 {offsets = [0, 64], sizes = [8, 32], strides = [1, 1]} : vector<8x128xf32> to vector<8x32xf32>
    %36 = vector.extract_strided_slice %27 {offsets = [0, 96], sizes = [8, 32], strides = [1, 1]} : vector<8x128xf32> to vector<8x32xf32>
    %37 = arith.mulf %33, %34 : vector<8x32xf32>
    %c0_19 = arith.constant 0 : index
    %c0_20 = arith.constant 0 : index
    %38 = vector.load %arg9[%c0_19, %c0_20] : memref<32x8xf32, #tpu.memory_space<vmem>>, vector<32x8xf32>
    %cst_21 = arith.constant dense<0.000000e+00> : vector<8x8xf32>
    %39 = tpu.matmul %37, %38, %cst_21 {dimension_numbers = #tpu.dot_dimension_numbers<[1], [0], [0], [1], [0, 0, 1, 1], [], []>} : vector<8x32xf32>, vector<32x8xf32>, vector<8x8xf32> -> vector<8x8xf32>
    %c0_22 = arith.constant 0 : index
    %c0_23 = arith.constant 0 : index
    %40 = vector.load %arg11[%c0_22, %c0_23] : memref<1x8xf32, #tpu.memory_space<vmem>>, vector<1x8xf32>
    %41 = vector.broadcast %40 : vector<1x8xf32> to vector<8x8xf32>
    %42 = arith.subf %39, %41 : vector<8x8xf32>
    %43 = math.exp %42 : vector<8x8xf32>
    %c0_24 = arith.constant 0 : index
    %c0_25 = arith.constant 0 : index
    %44 = vector.load %arg12[%c0_24, %c0_25] : memref<1x8xf32, #tpu.memory_space<vmem>>, vector<1x8xf32>
    %45 = vector.broadcast %44 : vector<1x8xf32> to vector<8x8xf32>
    %46 = arith.mulf %43, %45 : vector<8x8xf32>
    %c0_26 = arith.constant 0 : index
    %c0_27 = arith.constant 0 : index
    %47 = vector.load %arg10[%c0_26, %c0_27] : memref<8x32xf32, #tpu.memory_space<vmem>>, vector<8x32xf32>
    %cst_28 = arith.constant dense<0.000000e+00> : vector<8x32xf32>
    %48 = tpu.matmul %46, %47, %cst_28 {dimension_numbers = #tpu.dot_dimension_numbers<[1], [0], [0], [1], [0, 0, 1, 1], [], []>} : vector<8x8xf32>, vector<8x32xf32>, vector<8x32xf32> -> vector<8x32xf32>
    %49 = arith.mulf %35, %48 : vector<8x32xf32>
    %c0_29 = arith.constant 0 : index
    %c0_30 = arith.constant 0 : index
    %50 = vector.load %arg13[%c0_29, %c0_30] : memref<32x32xf32, #tpu.memory_space<vmem>>, vector<32x32xf32>
    %cst_31 = arith.constant dense<0.000000e+00> : vector<8x32xf32>
    %51 = tpu.matmul %49, %50, %cst_31 {dimension_numbers = #tpu.dot_dimension_numbers<[1], [0], [0], [1], [0, 0, 1, 1], [], []>} : vector<8x32xf32>, vector<32x32xf32>, vector<8x32xf32> -> vector<8x32xf32>
    %c0_32 = arith.constant 0 : index
    %c0_33 = arith.constant 0 : index
    %52 = vector.load %arg14[%c0_32, %c0_33] : memref<1x32xf32, #tpu.memory_space<vmem>>, vector<1x32xf32>
    %53 = vector.broadcast %52 : vector<1x32xf32> to vector<8x32xf32>
    %54 = arith.addf %51, %53 : vector<8x32xf32>
    %55 = arith.addf %54, %32 : vector<8x32xf32>
    %56 = arith.negf %55 : vector<8x32xf32>
    %57 = math.exp %56 : vector<8x32xf32>
    %cst_34 = arith.constant 1.000000e+00 : f32
    %58 = vector.broadcast %cst_34 : f32 to vector<8x32xf32>
    %59 = arith.addf %58, %57 : vector<8x32xf32>
    %60 = arith.divf %58, %59 : vector<8x32xf32>
    %61 = arith.subf %36, %49 : vector<8x32xf32>
    %62 = arith.mulf %60, %61 : vector<8x32xf32>
    %63 = arith.addf %49, %62 : vector<8x32xf32>
    %c0_35 = arith.constant 0 : index
    %c0_36 = arith.constant 0 : index
    %64 = vector.load %arg15[%c0_35, %c0_36] : memref<32x32xf32, #tpu.memory_space<vmem>>, vector<32x32xf32>
    %cst_37 = arith.constant dense<0.000000e+00> : vector<8x32xf32>
    %65 = tpu.matmul %63, %64, %cst_37 {dimension_numbers = #tpu.dot_dimension_numbers<[1], [0], [0], [1], [0, 0, 1, 1], [], []>} : vector<8x32xf32>, vector<32x32xf32>, vector<8x32xf32> -> vector<8x32xf32>
    %c0_38 = arith.constant 0 : index
    %c0_39 = arith.constant 0 : index
    %66 = vector.load %arg16[%c0_38, %c0_39] : memref<1x32xf32, #tpu.memory_space<vmem>>, vector<1x32xf32>
    %67 = vector.broadcast %66 : vector<1x32xf32> to vector<8x32xf32>
    %68 = arith.addf %65, %67 : vector<8x32xf32>
    %69 = arith.addf %0, %68 : vector<8x32xf32>
    %c0_40 = arith.constant 0 : index
    %c0_41 = arith.constant 0 : index
    %70 = vector.load %arg17[%c0_40, %c0_41] : memref<1x32xf32, #tpu.memory_space<vmem>>, vector<1x32xf32>
    %c0_42 = arith.constant 0 : index
    %c0_43 = arith.constant 0 : index
    %71 = vector.load %arg18[%c0_42, %c0_43] : memref<1x32xf32, #tpu.memory_space<vmem>>, vector<1x32xf32>
    %cst_44 = arith.constant dense<0.000000e+00> : vector<8xf32>
    %72 = vector.multi_reduction <add>, %69, %cst_44 [1] : vector<8x32xf32> to vector<8xf32>
    %73 = vector.shape_cast %72 : vector<8xf32> to vector<8x1xf32>
    %cst_45 = arith.constant 3.200000e+01 : f32
    %74 = vector.broadcast %cst_45 : f32 to vector<8x1xf32>
    %75 = arith.divf %73, %74 : vector<8x1xf32>
    %76 = vector.broadcast %75 : vector<8x1xf32> to vector<8x32xf32>
    %77 = arith.subf %69, %76 : vector<8x32xf32>
    %78 = arith.mulf %77, %77 : vector<8x32xf32>
    %cst_46 = arith.constant dense<0.000000e+00> : vector<8xf32>
    %79 = vector.multi_reduction <add>, %78, %cst_46 [1] : vector<8x32xf32> to vector<8xf32>
    %80 = vector.shape_cast %79 : vector<8xf32> to vector<8x1xf32>
    %cst_47 = arith.constant 3.200000e+01 : f32
    %81 = vector.broadcast %cst_47 : f32 to vector<8x1xf32>
    %82 = arith.divf %80, %81 : vector<8x1xf32>
    %cst_48 = arith.constant 9.99999974E-6 : f32
    %83 = vector.broadcast %cst_48 : f32 to vector<8x1xf32>
    %84 = arith.addf %82, %83 : vector<8x1xf32>
    %85 = math.rsqrt %84 : vector<8x1xf32>
    %86 = vector.broadcast %85 : vector<8x1xf32> to vector<8x32xf32>
    %87 = arith.mulf %77, %86 : vector<8x32xf32>
    %88 = vector.broadcast %70 : vector<1x32xf32> to vector<8x32xf32>
    %89 = arith.mulf %87, %88 : vector<8x32xf32>
    %90 = vector.broadcast %71 : vector<1x32xf32> to vector<8x32xf32>
    %91 = arith.addf %89, %90 : vector<8x32xf32>
    %c0_49 = arith.constant 0 : index
    %c0_50 = arith.constant 0 : index
    %92 = vector.load %arg19[%c0_49, %c0_50] : memref<32x128xf32, #tpu.memory_space<vmem>>, vector<32x128xf32>
    %cst_51 = arith.constant dense<0.000000e+00> : vector<8x128xf32>
    %93 = tpu.matmul %91, %92, %cst_51 {dimension_numbers = #tpu.dot_dimension_numbers<[1], [0], [0], [1], [0, 0, 1, 1], [], []>} : vector<8x32xf32>, vector<32x128xf32>, vector<8x128xf32> -> vector<8x128xf32>
    %c0_52 = arith.constant 0 : index
    %c0_53 = arith.constant 0 : index
    %94 = vector.load %arg20[%c0_52, %c0_53] : memref<1x128xf32, #tpu.memory_space<vmem>>, vector<1x128xf32>
    %95 = vector.broadcast %94 : vector<1x128xf32> to vector<8x128xf32>
    %96 = arith.addf %93, %95 : vector<8x128xf32>
    %cst_54 = arith.constant 0.000000e+00 : f32
    %97 = vector.broadcast %cst_54 : f32 to vector<8x128xf32>
    %98 = arith.maximumf %96, %97 : vector<8x128xf32>
    %c0_55 = arith.constant 0 : index
    %c0_56 = arith.constant 0 : index
    %99 = vector.load %arg21[%c0_55, %c0_56] : memref<128x32xf32, #tpu.memory_space<vmem>>, vector<128x32xf32>
    %cst_57 = arith.constant dense<0.000000e+00> : vector<8x32xf32>
    %100 = tpu.matmul %98, %99, %cst_57 {dimension_numbers = #tpu.dot_dimension_numbers<[1], [0], [0], [1], [0, 0, 1, 1], [], []>} : vector<8x128xf32>, vector<128x32xf32>, vector<8x32xf32> -> vector<8x32xf32>
    %c0_58 = arith.constant 0 : index
    %c0_59 = arith.constant 0 : index
    %101 = vector.load %arg22[%c0_58, %c0_59] : memref<1x32xf32, #tpu.memory_space<vmem>>, vector<1x32xf32>
    %102 = vector.broadcast %101 : vector<1x32xf32> to vector<8x32xf32>
    %103 = arith.addf %100, %102 : vector<8x32xf32>
    %104 = arith.addf %69, %103 : vector<8x32xf32>
    %c8_i32 = arith.constant 8 : i32
    %105 = arith.muli %arg0, %c8_i32 : i32
    %106 = tpu.iota {dimensions = array<i32: 0>} : vector<8x1xi32>
    %107 = vector.broadcast %105 : i32 to vector<8x1xi32>
    %108 = arith.addi %107, %106 : vector<8x1xi32>
    %c0_60 = arith.constant 0 : index
    %109 = memref.load %arg1[%c0_60] : memref<1xi32, #tpu.memory_space<smem>>
    %110 = vector.broadcast %109 : i32 to vector<8x1xi32>
    %111 = arith.cmpi slt, %108, %110 : vector<8x1xi32>
    %cst_61 = arith.constant 0.000000e+00 : f32
    %112 = vector.shape_cast %111 : vector<8x1xi1> to vector<8x1xi1>
    %113 = vector.broadcast %112 : vector<8x1xi1> to vector<8x32xi1>
    %114 = vector.broadcast %cst_61 : f32 to vector<8x32xf32>
    %115 = arith.select %113, %104, %114 : vector<8x32xi1>, vector<8x32xf32>
    %c0_62 = arith.constant 0 : index
    %c0_63 = arith.constant 0 : index
    %116 = vector.load %arg23[%c0_62, %c0_63] : memref<8x32xf32, #tpu.memory_space<vmem>>, vector<8x32xf32>
    tpu.vector_store %arg23[%c0_62, %c0_63], %115 {strides = array<i32>} : memref<8x32xf32, #tpu.memory_space<vmem>>, vector<8x32xf32>,
    return
  }
  func.func @transform_0(%arg0: i32, %arg1: memref<1xi32, #tpu.memory_space<smem>>) -> (i32, i32) {
    %c0_i32 = arith.constant 0 : i32
    %c0_i32_0 = arith.constant 0 : i32
    return %arg0, %c0_i32 : i32, i32
  }
  func.func @transform_1(%arg0: i32, %arg1: memref<1xi32, #tpu.memory_space<smem>>) -> (i32, i32) {
    %c0_i32 = arith.constant 0 : i32
    %c0_i32_0 = arith.constant 0 : i32
    %c0_i32_1 = arith.constant 0 : i32
    return %c0_i32, %c0_i32_0 : i32, i32
  }
  func.func @transform_2(%arg0: i32, %arg1: memref<1xi32, #tpu.memory_space<smem>>) -> (i32, i32) {
    %c0_i32 = arith.constant 0 : i32
    %c0_i32_0 = arith.constant 0 : i32
    %c0_i32_1 = arith.constant 0 : i32
    return %c0_i32, %c0_i32_0 : i32, i32
  }
  func.func @transform_3(%arg0: i32, %arg1: memref<1xi32, #tpu.memory_space<smem>>) -> (i32, i32) {
    %c0_i32 = arith.constant 0 : i32
    %c0_i32_0 = arith.constant 0 : i32
    %c0_i32_1 = arith.constant 0 : i32
    return %c0_i32, %c0_i32_0 : i32, i32
  }
  func.func @transform_4(%arg0: i32, %arg1: memref<1xi32, #tpu.memory_space<smem>>) -> (i32, i32) {
    %c0_i32 = arith.constant 0 : i32
    %c0_i32_0 = arith.constant 0 : i32
    %c0_i32_1 = arith.constant 0 : i32
    return %c0_i32, %c0_i32_0 : i32, i32
  }
  func.func @transform_5(%arg0: i32, %arg1: memref<1xi32, #tpu.memory_space<smem>>) -> (i32, i32) {
    %c0_i32 = arith.constant 0 : i32
    %c0_i32_0 = arith.constant 0 : i32
    %c0_i32_1 = arith.constant 0 : i32
    return %c0_i32, %c0_i32_0 : i32, i32
  }
  func.func @transform_6(%arg0: i32, %arg1: memref<1xi32, #tpu.memory_space<smem>>) -> (i32, i32) {
    %c0_i32 = arith.constant 0 : i32
    %c0_i32_0 = arith.constant 0 : i32
    %c0_i32_1 = arith.constant 0 : i32
    return %c0_i32, %c0_i32_0 : i32, i32
  }
  func.func @transform_7(%arg0: i32, %arg1: memref<1xi32, #tpu.memory_space<smem>>) -> (i32, i32) {
    %c0_i32 = arith.constant 0 : i32
    %c0_i32_0 = arith.constant 0 : i32
    %c0_i32_1 = arith.constant 0 : i32
    return %c0_i32, %c0_i32_0 : i32, i32
  }
  func.func @transform_8(%arg0: i32, %arg1: memref<1xi32, #tpu.memory_space<smem>>) -> (i32, i32) {
    %c0_i32 = arith.constant 0 : i32
    %c0_i32_0 = arith.constant 0 : i32
    %c0_i32_1 = arith.constant 0 : i32
    return %c0_i32, %c0_i32_0 : i32, i32
  }
  func.func @transform_9(%arg0: i32, %arg1: memref<1xi32, #tpu.memory_space<smem>>) -> (i32, i32) {
    %c0_i32 = arith.constant 0 : i32
    %c0_i32_0 = arith.constant 0 : i32
    %c0_i32_1 = arith.constant 0 : i32
    return %c0_i32, %c0_i32_0 : i32, i32
  }
  func.func @transform_10(%arg0: i32, %arg1: memref<1xi32, #tpu.memory_space<smem>>) -> (i32, i32) {
    %c0_i32 = arith.constant 0 : i32
    %c0_i32_0 = arith.constant 0 : i32
    %c0_i32_1 = arith.constant 0 : i32
    return %c0_i32, %c0_i32_0 : i32, i32
  }
  func.func @transform_11(%arg0: i32, %arg1: memref<1xi32, #tpu.memory_space<smem>>) -> (i32, i32) {
    %c0_i32 = arith.constant 0 : i32
    %c0_i32_0 = arith.constant 0 : i32
    %c0_i32_1 = arith.constant 0 : i32
    return %c0_i32, %c0_i32_0 : i32, i32
  }
  func.func @transform_12(%arg0: i32, %arg1: memref<1xi32, #tpu.memory_space<smem>>) -> (i32, i32) {
    %c0_i32 = arith.constant 0 : i32
    %c0_i32_0 = arith.constant 0 : i32
    %c0_i32_1 = arith.constant 0 : i32
    return %c0_i32, %c0_i32_0 : i32, i32
  }
  func.func @transform_13(%arg0: i32, %arg1: memref<1xi32, #tpu.memory_space<smem>>) -> (i32, i32) {
    %c0_i32 = arith.constant 0 : i32
    %c0_i32_0 = arith.constant 0 : i32
    %c0_i32_1 = arith.constant 0 : i32
    return %c0_i32, %c0_i32_0 : i32, i32
  }
  func.func @transform_14(%arg0: i32, %arg1: memref<1xi32, #tpu.memory_space<smem>>) -> (i32, i32) {
    %c0_i32 = arith.constant 0 : i32
    %c0_i32_0 = arith.constant 0 : i32
    %c0_i32_1 = arith.constant 0 : i32
    return %c0_i32, %c0_i32_0 : i32, i32
  }
  func.func @transform_15(%arg0: i32, %arg1: memref<1xi32, #tpu.memory_space<smem>>) -> (i32, i32) {
    %c0_i32 = arith.constant 0 : i32
    %c0_i32_0 = arith.constant 0 : i32
    %c0_i32_1 = arith.constant 0 : i32
    return %c0_i32, %c0_i32_0 : i32, i32
  }
  func.func @transform_16(%arg0: i32, %arg1: memref<1xi32, #tpu.memory_space<smem>>) -> (i32, i32) {
    %c0_i32 = arith.constant 0 : i32
    %c0_i32_0 = arith.constant 0 : i32
    %c0_i32_1 = arith.constant 0 : i32
    return %c0_i32, %c0_i32_0 : i32, i32
  }
  func.func @transform_17(%arg0: i32, %arg1: memref<1xi32, #tpu.memory_space<smem>>) -> (i32, i32) {
    %c0_i32 = arith.constant 0 : i32
    %c0_i32_0 = arith.constant 0 : i32
    %c0_i32_1 = arith.constant 0 : i32
    return %c0_i32, %c0_i32_0 : i32, i32
  }
  func.func @transform_18(%arg0: i32, %arg1: memref<1xi32, #tpu.memory_space<smem>>) -> (i32, i32) {
    %c0_i32 = arith.constant 0 : i32
    %c0_i32_0 = arith.constant 0 : i32
    %c0_i32_1 = arith.constant 0 : i32
    return %c0_i32, %c0_i32_0 : i32, i32
  }
  func.func @transform_19(%arg0: i32, %arg1: memref<1xi32, #tpu.memory_space<smem>>) -> (i32, i32) {
    %c0_i32 = arith.constant 0 : i32
    %c0_i32_0 = arith.constant 0 : i32
    %c0_i32_1 = arith.constant 0 : i32
    return %c0_i32, %c0_i32_0 : i32, i32
  }
  func.func @transform_20(%arg0: i32, %arg1: memref<1xi32, #tpu.memory_space<smem>>) -> (i32, i32) {
    %c0_i32 = arith.constant 0 : i32
    %c0_i32_0 = arith.constant 0 : i32
    %c0_i32_1 = arith.constant 0 : i32
    return %c0_i32, %c0_i32_0 : i32, i32
  }
  func.func @transform_21(%arg0: i32, %arg1: memref<1xi32, #tpu.memory_space<smem>>) -> (i32, i32) {
    %c0_i32 = arith.constant 0 : i32
    %c0_i32_0 = arith.constant 0 : i32
    return %arg0, %c0_i32 : i32, i32
  }
}

</mosaic_0001>

<bundles_post_ra>
// kernel: _forward_padded.6
= control target key start
LH: loop header
LB: loop body
LE: loop exit
PB: predicated region body
PF: predicated region fallthrough
CT: control target
= control target key end

     0   :  { %s579_s29 = smov 0   ;;  %s648_s0 = inlined_call_operand.<no memory space> [shape: s32[1], index: 0, kind: input, shape index: {}]   ;;  %s649_s1 = inlined_call_operand.vmem [shape: f32[32,32], index: 1, kind: input, shape index: {}]   ;;  %s650_s2 = inlined_call_operand.vmem [shape: f32[1,32], index: 2, kind: input, shape index: {}]   ;;  %s651_s3 = inlined_call_operand.vmem [shape: f32[1,32], index: 3, kind: input, shape index: {}]   ;;  %s652_s4 = inlined_call_operand.vmem [shape: f32[32,64], index: 4, kind: input, shape index: {}]   ;;  %s653_s5 = inlined_call_operand.vmem [shape: f32[1,64], index: 5, kind: input, shape index: {}]   ;;  %s654_s6 = inlined_call_operand.vmem [shape: f32[32,8], index: 6, kind: input, shape index: {}]   ;;  %s655_s7 = inlined_call_operand.vmem [shape: f32[4,1,8], index: 7, kind: output, shape index: {0}]   ;;  %s656_s8 = inlined_call_operand.vmem [shape: f32[4,1,8], index: 8, kind: output, shape index: {1}]  }
   0x1   :  { %14 = sst [smem:[#allocation3]] %s648_s0 }
   0x2 LB: > { %s585_s30 = sadd.s32 4294967295, %s527_s29   ;;  %p495_p0 = scmp.ge.s32.totalorder %s527_s29, 1  ;;  %s527_s29 = sphi %s579_s29, %s20_s29  }
   0x3   : > { %p241_p1 = scmp.lt.s32.totalorder %s527_s29, 5 }
   0x5   : > { %p242_p2 = pnand %p495_p0, %p241_p1 }
   0x6   : > { %p273_p3 = scmp.lt.s32.totalorder (!%p242_p2), %s585_s30, 3  ;;  %s530_s13 = smov (!%p242_p2), 96  }
   0x7   : > { %245 = sbr.rel (%p242_p2) target bundleno = 695 (0x2b7), region = 44  ;;  %s392_s16 = sld [smem:[#allocation3]] (!%p242_p2) }
   0x8   : > { %s499_s17 = sshll.u32 (!%p242_p2), %s585_s30, 3 }
   0xc   : > { %s591_s0 = scalar_select %p273_p3, %s585_s30, 3  ;;  %vm286_vm0 = vcmask 261120   ;;  %v529_v2 = vmov 32.0   ;;  %v327_v14 = vld [vmem:[%s652_s4 + $0x18] sm:$0xff]  ;;  %v326_v15 = vld [vmem:[%s652_s4 + $0x10] sm:$0xff]  ;;  %v325_v16 = vld [vmem:[%s652_s4 + $0x8] sm:$0xff]  ;;  %v388_v42 = vlaneseq  ;;  %v390_v44 = vstv %s499_s17 }
   0xd   : > { %515 = vrcp.f32 %v529_v2  ;;  %347 = vmatpush.msra.mxu0 %v327_v14  ;;  %v324_v17 = vld [vmem:[%s652_s4] sm:$0xff]  ;;  %v363_v33 = vld [vmem:[%s654_s6 + $0x18] sm:$0xff]  ;;  %v362_v34 = vld [vmem:[%s654_s6 + $0x10] sm:$0xff]  ;;  %v393_v46 = vstv %s392_s16  ;;  %vm398_vm6 = vcmask 64512   ;;  %vm416_vm7 = vcmask 57344  }
   0xe   : > { %s496_s9 = sshll.u32 %s591_s0, 3  ;;  %v512_v27 = vld [vmem:[%s650_s2] ss:$0 sm:$0xff]  ;;  %379 = vmatpush.msra.mxu1 %v363_v33  ;;  %v361_v35 = vld [vmem:[%s654_s6 + $0x8] sm:$0xff]  ;;  %v389_v43 = vshrl.u32 %v388_v42, 7  ;;  %s279_s30 = scalar_lea.vmem %s655_s7, %s591_s0 }
   0xf   : > { %s276_s12 = scalar_lea.vmem %s649_s1, %s496_s9  ;;  %348 = vmatpush.msra.mxu0 %v326_v15  ;;  %v513_v30 = vld [vmem:[%s651_s3] ss:$0 sm:$0xff]  ;;  %s282_s22 = scalar_lea.vmem %s656_s8, %s591_s0 }
  0x10   : > { %v283_v0 = vld [vmem:[%s276_s12] sm:$0xff]  ;;  %380 = vmatpush.msra.mxu1 %v362_v34  ;;  %v391_v45 = vadd.s32 %v390_v44, %v389_v43 }
  0x11   : > { %v287_v1 = vsel %vm286_vm0, %v283_v0, 0.0  ;;  %349 = vmatpush.msra.mxu0 %v325_v16  ;;  %v514_v36 = vld [vmem:[%s653_s5] ss:$0 sm:$0xff] }
  0x12   : > { %288 = vadd.xlane.f32.xlu0 %v287_v1  ;;  %381 = vmatpush.msra.mxu1 %v361_v35  ;;  %v360_v39 = vld [vmem:[%s654_s6] sm:$0xff]  ;;  %vm394_vm5 = vcmp.lt.s32.totalorder %v391_v45, %v393_v46 }
  0x13   : > { %v516_v3 = vpop.eup %515  ;;  %350 = vmatpush.msra.mxu0 %v324_v17 }
  0x14   : > { %v291_v4 = vmul.f32 32.0, %v516_v3  ;;  %vm295_vm1 = vweird.f32 %v516_v3  ;;  %382 = vmatpush.msra.mxu1 %v360_v39 }
  0x16   : > { %v292_v5 = vsub.f32 1.0, %v291_v4 }
  0x18   : > { %v293_v6 = vmul.f32 %v516_v3, %v292_v5 }
  0x1a   : > { %v294_v7 = vadd.f32 %v516_v3, %v293_v6 }
  0x1c   : > { %v296_v8 = vsel %vm295_vm1, %v516_v3, %v294_v7 }
  0x85   : > { %v289_v9 = vpop.xlane.xlu0 %288 }
  0x86   : > { %v297_v10 = vmul.f32 %v296_v8, %v289_v9 }
  0x88   : > { %v298_v11 = vsub.f32 %v283_v0, %v297_v10 }
  0x8a   : > { %v299_v12 = vmul.f32 %v298_v11, %v298_v11 }
  0x8c   : > { %v300_v13 = vsel %vm286_vm0, %v299_v12, 0.0 }
  0x8d   : > { %301 = vadd.xlane.f32.xlu0 %v300_v13 }
 0x100   : > { %v302_v18 = vpop.xlane.xlu0 %301 }
 0x101   : > { %v303_v19 = vmul.f32 %v302_v18, %v296_v8 }
 0x103   : > { %v304_v20 = vadd.f32 1e-05, %v303_v19 }
 0x105   : > { %517 = vrsqrt.f32 %v304_v20  ;;  %vm311_vm3 = vweird.f32 %v304_v20 }
 0x10b   : > { %v518_v21 = vpop.eup %517 }
 0x10c   : > { %v306_v22 = vmul.f32 %v518_v21, %v304_v20  ;;  %vm312_vm2 = vweird.f32 %v518_v21 }
 0x10d   : > { %vm313_vm4 = vmor %vm311_vm3, %vm312_vm2 }
 0x10e   : > { %v307_v23 = vmul.f32 %v518_v21, %v306_v22 }
 0x110   : > { %v308_v24 = vmul.f32 0.5, %v307_v23 }
 0x112   : > { %v309_v25 = vsub.f32 1.5, %v308_v24 }
 0x114   : > { %v310_v26 = vmul.f32 %v518_v21, %v309_v25 }
 0x116   : > { %v314_v28 = vsel %vm313_vm4, %v518_v21, %v310_v26 }
 0x117   : > { %v315_v29 = vmul.f32 %v314_v28, %v298_v11 }
 0x119   : > { %v319_v31 = vmul.f32 %v512_v27, %v315_v29 }
 0x11b   : > { %v323_v32 = vadd.f32 %v513_v30, %v319_v31 }
 0x11d   : > { %497 = vmatmul.msk.f32.vlgmr.msra.gmra.mxu0 %vm286_vm0, %v323_v32 }
 0x19a   : > { %v352_v37 = vpop.f32.mrf.mxu0 }
 0x19b   : > { %v353_v38 = vadd.f32 %v514_v36, %v352_v37 }
 0x19d   : > { %356 = vrot.lane.b32.xlu1 %v353_v38, %s530_s13 }
 0x20f   : > { %v357_v40 = vpop.permute.xlu1 %356 }
 0x210   : > { %v359_v41 = vmul.f32 %v357_v40, %v353_v38 }
 0x212   : > { %498 = vmatmul.msk.f32.vlgmr.msra.gmra.mxu1 %vm286_vm0, %v359_v41 }
 0x28f   : > { %v384_v47 = vpop.f32.mrf.mxu1 }
 0x290   : > { %v397_v48 = vsel %vm394_vm5, %v384_v47, -1e+30 }
 0x291   : > { %v399_v49 = vsel %vm398_vm6, %v397_v48, -inf }
 0x292   : > { %v400_v50 = vrot.slane %v399_v49, 4 }
 0x294   : > { %v401_v51 = vmax.f32 %v399_v49, %v400_v50 }
 0x296   : > { %v402_v52 = vrot.slane %v401_v51, 2 }
 0x298   : > { %v403_v53 = vmax.f32 %v401_v51, %v402_v52 }
 0x29a   : > { %v404_v54 = vrot.slane %v403_v53, 1 }
 0x29c   : > { %v405_v55 = vmax.f32 %v403_v53, %v404_v54 }
 0x29e   : > { %v406_v56 = vsub.f32 %v397_v48, %v405_v55  ;;  %417 = vst.msk [vmem:[%s279_s30] sm:$0x1] %vm416_vm7, %v405_v55 }
 0x2a0   : > { %v407_v57 = vmul.f32 1.442695, %v406_v56 }
 0x2a2   : > { %519 = vpow2.f32 %v407_v57 }
 0x2a8   : > { %v520_v58 = vpop.eup %519 }
 0x2a9   : > { %v409_v59 = vsel %vm398_vm6, %v520_v58, 0.0 }
 0x2aa   : > { %v410_v60 = vrot.slane %v409_v59, 4 }
 0x2ac   : > { %v411_v61 = vadd.f32 %v410_v60, %v409_v59 }
 0x2ae   : > { %v412_v62 = vrot.slane %v411_v61, 2 }
 0x2b0   : > { %v413_v63 = vadd.f32 %v412_v62, %v411_v61 }
 0x2b2   : > { %v414_v0 = vrot.slane %v413_v63, 1 }
 0x2b4   : > { %v415_v1 = vadd.f32 %v414_v0, %v413_v63 }
 0x2b6   : > { %418 = vst.msk [vmem:[%s282_s22] sm:$0x1] %vm416_vm7, %v415_v1 }
 0x2b7 PF: > { %s20_s29 = sadd.s32 1, %s527_s29  }
 0x2b8   : > { %p17_p4 = scmp.ge.s32.totalorder %s20_s29, 6  }
 0x2ba   :  { %19 = sbr.rel (!%p17_p4) target bundleno = 2 (0x2), region = 86 }

// kernel: _forward_padded.5
= control target key start
LH: loop header
LB: loop body
LE: loop exit
PB: predicated region body
PF: predicated region fallthrough
CT: control target
= control target key end

     0   :  { %s522_s24 = smov 0   ;;  %s633_s0 = inlined_call_operand.vmem [shape: f32[32,64], index: 0, kind: input, shape index: {}]   ;;  %s634_s1 = inlined_call_operand.vmem [shape: f32[1,64], index: 1, kind: input, shape index: {}]   ;;  %s635_s2 = inlined_call_operand.vmem [shape: f32[1,64], index: 2, kind: input, shape index: {}]   ;;  %s636_s3 = inlined_call_operand.vmem [shape: f32[64,128], index: 3, kind: input, shape index: {}]   ;;  %s637_s4 = inlined_call_operand.vmem [shape: f32[1,128], index: 4, kind: input, shape index: {}]   ;;  %s638_s5 = inlined_call_operand.vmem [shape: f32[128,32], index: 5, kind: input, shape index: {}]   ;;  %s639_s6 = inlined_call_operand.vmem [shape: f32[1,32], index: 6, kind: input, shape index: {}]   ;;  %s640_s7 = inlined_call_operand.vmem [shape: f32[32,32], index: 7, kind: output, shape index: {}]  }
   0x1 LB: > { %s446_s25 = sadd.s32 4294967295, %s479_s24   ;;  %p450_p0 = scmp.ge.s32.totalorder %s479_s24, 1  ;;  %s479_s24 = sphi %s522_s24, %s17_s24  }
   0x2   : > { %p236_p1 = scmp.lt.s32.totalorder %s479_s24, 5 }
   0x4   : > { %p237_p2 = pnand %p450_p0, %p236_p1 }
   0x5   : > { %p266_p3 = scmp.lt.s32.totalorder (!%p237_p2), %s446_s25, 3 }
   0x6   : > { %240 = sbr.rel (%p237_p2) target bundleno = 542 (0x21e), region = 48 }
   0xb   : > { %s642_s25 = smov (!%p266_p3, %s446_s25), 3  ;;  %vm277_vm0 = vcmask 523264   ;;  %v481_v2 = vmov 64.0   ;;  %v322_v14 = vld [vmem:[%s636_s3 + $0x38] sm:$0xff]  ;;  %v321_v15 = vld [vmem:[%s636_s3 + $0x30] sm:$0xff]  ;;  %v320_v16 = vld [vmem:[%s636_s3 + $0x28] sm:$0xff] }
   0xc   : > { %s451_s26 = sshll.u32 %s642_s25, 3  ;;  %469 = vrcp.f32 %v481_v2  ;;  %338 = vmatpush.msra.mxu0 %v322_v14  ;;  %v319_v17 = vld [vmem:[%s636_s3 + $0x20] sm:$0xff]  ;;  %v318_v18 = vld [vmem:[%s636_s3 + $0x18] sm:$0xff]  ;;  %v317_v19 = vld [vmem:[%s636_s3 + $0x10] sm:$0xff]  ;;  %vm391_vm5 = vcmask 261120  }
   0xd   : > { %s269_s29 = scalar_lea.vmem %s633_s0, %s451_s26  ;;  %v316_v20 = vld [vmem:[%s636_s3 + $0x8] sm:$0xff]  ;;  %v315_v21 = vld [vmem:[%s636_s3] sm:$0xff]  ;;  %v366_v22 = vld [vmem:[%s638_s5 + $0x78] sm:$0xff]  ;;  %s273_s28 = scalar_lea.vmem %s640_s7, %s451_s26 }
   0xe   : > { %v274_v0 = vld [vmem:[%s269_s29] sm:$0xff]  ;;  %339 = vmatpush.msra.mxu0 %v321_v15  ;;  %v365_v23 = vld [vmem:[%s638_s5 + $0x70] sm:$0xff]  ;;  %371 = vmatpush.msra.mxu1 %v366_v22  ;;  %v364_v24 = vld [vmem:[%s638_s5 + $0x68] sm:$0xff] }
   0xf   : > { %v278_v1 = vsel %vm277_vm0, %v274_v0, 0.0  ;;  %v363_v27 = vld [vmem:[%s638_s5 + $0x60] sm:$0xff]  ;;  %v362_v29 = vld [vmem:[%s638_s5 + $0x58] sm:$0xff]  ;;  %v361_v30 = vld [vmem:[%s638_s5 + $0x50] sm:$0xff] }
  0x10   : > { %279 = vadd.xlane.f32.xlu0 %v278_v1  ;;  %340 = vmatpush.msra.mxu0 %v320_v16  ;;  %v360_v31 = vld [vmem:[%s638_s5 + $0x48] sm:$0xff]  ;;  %v359_v32 = vld [vmem:[%s638_s5 + $0x40] sm:$0xff]  ;;  %v358_v34 = vld [vmem:[%s638_s5 + $0x38] sm:$0xff] }
  0x11   : > { %372 = vmatpush.msra.mxu1 %v365_v23  ;;  %v357_v36 = vld [vmem:[%s638_s5 + $0x30] sm:$0xff]  ;;  %v356_v38 = vld [vmem:[%s638_s5 + $0x28] sm:$0xff]  ;;  %v355_v40 = vld [vmem:[%s638_s5 + $0x20] sm:$0xff] }
  0x12   : > { %v470_v3 = vpop.eup %469  ;;  %341 = vmatpush.msra.mxu0 %v319_v17  ;;  %v354_v42 = vld [vmem:[%s638_s5 + $0x18] sm:$0xff]  ;;  %v465_v44 = vld [vmem:[%s634_s1] ss:$0 sm:$0xff]  ;;  %v353_v50 = vld [vmem:[%s638_s5 + $0x10] sm:$0xff] }
  0x13   : > { %v282_v4 = vmul.f32 64.0, %v470_v3  ;;  %vm286_vm1 = vweird.f32 %v470_v3  ;;  %373 = vmatpush.msra.mxu1 %v364_v24  ;;  %v466_v47 = vld [vmem:[%s635_s2] ss:$0 sm:$0xff]  ;;  %v352_v51 = vld [vmem:[%s638_s5 + $0x8] sm:$0xff] }
  0x14   : > { %342 = vmatpush.msra.mxu0 %v318_v18  ;;  %v351_v52 = vld [vmem:[%s638_s5] sm:$0xff] }
  0x15   : > { %v283_v5 = vsub.f32 1.0, %v282_v4  ;;  %374 = vmatpush.msra.mxu1 %v363_v27  ;;  %v467_v53 = vld [vmem:[%s637_s4] ss:$0 sm:$0xff] }
  0x16   : > { %343 = vmatpush.msra.mxu0 %v317_v19  ;;  %v468_v57 = vld [vmem:[%s639_s6] ss:$0 sm:$0xff] }
  0x17   : > { %v284_v6 = vmul.f32 %v470_v3, %v283_v5  ;;  %375 = vmatpush.msra.mxu1 %v362_v29 }
  0x18   : > { %344 = vmatpush.msra.mxu0 %v316_v20 }
  0x19   : > { %v285_v7 = vadd.f32 %v470_v3, %v284_v6  ;;  %376 = vmatpush.msra.mxu1 %v361_v30 }
  0x1a   : > { %345 = vmatpush.msra.mxu0 %v315_v21 }
  0x1b   : > { %v287_v8 = vsel %vm286_vm1, %v470_v3, %v285_v7  ;;  %377 = vmatpush.msra.mxu1 %v360_v31 }
  0x1d   : > { %378 = vmatpush.msra.mxu1 %v359_v32 }
  0x1f   : > { %379 = vmatpush.msra.mxu1 %v358_v34 }
  0x21   : > { %380 = vmatpush.msra.mxu1 %v357_v36 }
  0x23   : > { %381 = vmatpush.msra.mxu1 %v356_v38 }
  0x25   : > { %382 = vmatpush.msra.mxu1 %v355_v40 }
  0x27   : > { %383 = vmatpush.msra.mxu1 %v354_v42 }
  0x29   : > { %384 = vmatpush.msra.mxu1 %v353_v50 }
  0x2b   : > { %385 = vmatpush.msra.mxu1 %v352_v51 }
  0x2d   : > { %386 = vmatpush.msra.mxu1 %v351_v52 }
  0x83   : > { %v280_v9 = vpop.xlane.xlu0 %279 }
  0x84   : > { %v288_v10 = vmul.f32 %v287_v8, %v280_v9 }
  0x86   : > { %v289_v11 = vsub.f32 %v274_v0, %v288_v10 }
  0x88   : > { %v290_v12 = vmul.f32 %v289_v11, %v289_v11 }
  0x8a   : > { %v291_v13 = vsel %vm277_vm0, %v290_v12, 0.0 }
  0x8b   : > { %292 = vadd.xlane.f32.xlu0 %v291_v13 }
  0xfe   : > { %v293_v25 = vpop.xlane.xlu0 %292 }
  0xff   : > { %v294_v26 = vmul.f32 %v293_v25, %v287_v8 }
 0x101   : > { %v295_v28 = vadd.f32 1e-05, %v294_v26 }
 0x103   : > { %471 = vrsqrt.f32 %v295_v28  ;;  %vm302_vm3 = vweird.f32 %v295_v28 }
 0x109   : > { %v472_v33 = vpop.eup %471 }
 0x10a   : > { %v297_v35 = vmul.f32 %v472_v33, %v295_v28  ;;  %vm303_vm2 = vweird.f32 %v472_v33 }
 0x10b   : > { %vm304_vm4 = vmor %vm302_vm3, %vm303_vm2 }
 0x10c   : > { %v298_v37 = vmul.f32 %v472_v33, %v297_v35 }
 0x10e   : > { %v299_v39 = vmul.f32 0.5, %v298_v37 }
 0x110   : > { %v300_v41 = vsub.f32 1.5, %v299_v39 }
 0x112   : > { %v301_v43 = vmul.f32 %v472_v33, %v300_v41 }
 0x114   : > { %v305_v45 = vsel %vm304_vm4, %v472_v33, %v301_v43 }
 0x115   : > { %v306_v46 = vmul.f32 %v305_v45, %v289_v11 }
 0x117   : > { %v310_v48 = vmul.f32 %v465_v44, %v306_v46 }
 0x119   : > { %v314_v49 = vadd.f32 %v466_v47, %v310_v48 }
 0x11b   : > { %453 = vmatmul.msk.f32.vlgmr.msra.gmra.mxu0 %vm277_vm0, %v314_v49 }
 0x198   : > { %v347_v54 = vpop.f32.mrf.mxu0 }
 0x199   : > { %v348_v55 = vadd.f32 %v467_v53, %v347_v54 }
 0x19b   : > { %v350_v56 = vmax.f32 %v348_v55, 0.0 }
 0x19d   : > { %387 = vmatmul.f32.vlgmr.msra.gmra.mxu1 %v350_v56 }
 0x21a   : > { %v388_v58 = vpop.f32.mrf.mxu1 }
 0x21b   : > { %v389_v59 = vadd.f32 %v468_v57, %v388_v58 }
 0x21d   : > { %392 = vst.msk [vmem:[%s273_s28] sm:$0xff] %vm391_vm5, %v389_v59 }
 0x21e PF: > { %s17_s24 = sadd.s32 1, %s479_s24  }
 0x21f   : > { %p14_p4 = scmp.ge.s32.totalorder %s17_s24, 6  }
 0x221   :  { %16 = sbr.rel (!%p14_p4) target bundleno = 1 (0x1), region = 78 }

// kernel: _forward_padded.9
= control target key start
LH: loop header
LB: loop body
LE: loop exit
PB: predicated region body
PF: predicated region fallthrough
CT: control target
= control target key end

     0   :  { %s1668_s0 = inlined_call_operand.<no memory space> [shape: s32[1], index: 0, kind: input, shape index: {}]   ;;  %s1669_s1 = inlined_call_operand.vmem [shape: f32[32,32], index: 1, kind: input, shape index: {}]   ;;  %s1670_s2 = inlined_call_operand.vmem [shape: f32[1,32], index: 2, kind: input, shape index: {}]   ;;  %s1671_s3 = inlined_call_operand.vmem [shape: f32[1,32], index: 3, kind: input, shape index: {}]   ;;  %s1672_s4 = inlined_call_operand.vmem [shape: f32[32,128], index: 4, kind: input, shape index: {}]   ;;  %s1673_s5 = inlined_call_operand.vmem [shape: f32[1,128], index: 5, kind: input, shape index: {}]   ;;  %s1674_s6 = inlined_call_operand.vmem [shape: f32[32,32], index: 6, kind: input, shape index: {}]   ;;  %s1675_s7 = inlined_call_operand.vmem [shape: f32[1,32], index: 7, kind: input, shape index: {}]   ;;  %s1676_s8 = inlined_call_operand.vmem [shape: f32[32,8], index: 8, kind: input, shape index: {}]   ;;  %s1677_s9 = inlined_call_operand.vmem [shape: f32[8,32], index: 9, kind: input, shape index: {}]   ;;  %s1678_s10 = inlined_call_operand.vmem [shape: f32[1,8], index: 10, kind: input, shape index: {}]   ;;  %s1679_s11 = inlined_call_operand.vmem [shape: f32[1,8], index: 11, kind: input, shape index: {}]   ;;  %s1680_s12 = inlined_call_operand.vmem [shape: f32[32,32], index: 12, kind: input, shape index: {}]   ;;  %s1681_s13 = inlined_call_operand.vmem [shape: f32[1,32], index: 13, kind: input, shape index: {}]   ;;  %s1682_s14 = inlined_call_operand.vmem [shape: f32[32,32], index: 14, kind: input, shape index: {}]   ;;  %s1683_s15 = inlined_call_operand.vmem [shape: f32[1,32], index: 15, kind: input, shape index: {}]   ;;  %s1684_s16 = inlined_call_operand.vmem [shape: f32[1,32], index: 16, kind: input, shape index: {}]   ;;  %s1685_s17 = inlined_call_operand.vmem [shape: f32[1,32], index: 17, kind: input, shape index: {}]   ;;  %s1686_s18 = inlined_call_operand.vmem [shape: f32[32,128], index: 18, kind: input, shape index: {}]   ;;  %s1687_s19 = inlined_call_operand.vmem [shape: f32[1,128], index: 19, kind: input, shape index: {}]   ;;  %s1688_s20 = inlined_call_operand.vmem [shape: f32[128,32], index: 20, kind: input, shape index: {}]   ;;  %s1689_s21 = inlined_call_operand.vmem [shape: f32[1,32], index: 21, kind: input, shape index: {}]   ;;  %s1690_s22 = inlined_call_operand.hbm [shape: f32[32,32], index: 22, kind: output, shape index: {}]  }
   0x1   :  { %1699 = sst [smem:[#allocation13_spill]] %s1668_s0 }
   0x2   :  { %1700 = sst [smem:[#allocation14_spill]] %s1669_s1 }
   0x3   :  { %1701 = sst [smem:[#allocation15_spill]] %s1670_s2 }
   0x4   :  { %1702 = sst [smem:[#allocation16_spill]] %s1671_s3 }
   0x5   :  { %1703 = sst [smem:[#allocation17_spill]] %s1672_s4 }
   0x6   :  { %1704 = sst [smem:[#allocation18_spill]] %s1673_s5 }
   0x7   :  { %1705 = sst [smem:[#allocation19_spill]] %s1674_s6 }
   0x8   :  { %1706 = sst [smem:[#allocation20_spill]] %s1675_s7 }
   0x9   :  { %1707 = sst [smem:[#allocation21_spill]] %s1676_s8 }
   0xa   :  { %1708 = sst [smem:[#allocation22_spill]] %s1677_s9 }
   0xb   :  { %s1709_s29 = sld [smem:[#allocation13_spill]] }
  0x11   :  { %27 = sst [smem:[#allocation3]] %s1709_s29 }
  0x12   :  { %28 = vsyncpa [#allocation5], 0 }
  0x13   :  { %30 = vsyncpa [#allocation5 + $0x1], 0  ;;  %s1393_s30 = smov 0   ;;  %s1395_s4 = smov 0  }
  0x14   :  { %s1397_s0 = smov 0   ;;  %s1399_s23 = smov 0  }
  0x15 LB: > { %1710 = sst [smem:[#allocation7_spill]] %s1257_s30  ;;  %s1414_s1 = sadd.s32 4294967295, %s1269_s23   ;;  %s1269_s23 = sphi %s1399_s23, %s1730_s23   ;;  %s1265_s0 = sphi %s1397_s0, %s1732_s0   ;;  %s1261_s4 = sphi %s1395_s4, %s1734_s4   ;;  %s1257_s30 = sphi %s1393_s30, %s1733_s30  }
  0x16   : > { %1711 = sst [smem:[#allocation8_spill]] %s1265_s0  ;;  %s1121_s5 = sadd.s32 4294967294, %s1269_s23  }
  0x17   : > { %1712 = sst [smem:[#allocation9_spill]] %s1269_s23  ;;  %s1418_s24 = sadd.s32 1, %s1269_s23  }
  0x18   : > { %1713 = sst [smem:[#allocation10_spill]] %s1418_s24  ;;  %s489_s6 = sadd.s32 1, %s1265_s0 }
  0x19   : > { %s486_s25 = ssub.s32 %s1269_s23, %s1418_s24  ;;  %p499_p0 = scmp.ne.s32.totalorder %s1265_s0, %s1261_s4 }
  0x1a   : > { %p487_p1 = scmp.eq.s32.totalorder %s486_s25, 0  ;;  %p500_p2 = scmp.eq.s32.totalorder %s1414_s1, 3 }
  0x1b   : > { %p505_p3 = scmp.ne.s32.totalorder %s1261_s4, %s1257_s30  ;;  %p506_p4 = scmp.eq.s32.totalorder %s1121_s5, 3 }
  0x1c   : > { %s1429_s26 = scalar_select %p487_p1, %s1265_s0, %s489_s6  }
  0x1d   : > { %p1431_p5 = por %p500_p2, %p499_p0  ;;  %p1435_p6 = por %p506_p4, %p505_p3 }
  0x1e   : > { %1714 = sst [smem:[#allocation11_spill]] %s1429_s26  ;;  %p1124_p7 = scmp.ge.s32.totalorder %s1269_s23, 1 }
  0x1f   : > { %s1716_s27 = scalar_select %p1435_p6, 1, 0 }
  0x20   : > { %p591_p8 = scmp.lt.s32.totalorder %s1269_s23, 5 }
  0x21   : > { %1717 = sst [smem:[#allocation12_spill]] %s1716_s27 }
  0x22   : > { %p592_p9 = pnand %p1124_p7, %p591_p8 }
  0x23   : > { %p650_p10 = scmp.lt.s32.totalorder (!%p592_p9), %s1414_s1, 3  ;;  %s1718_s6 = sld [smem:[#allocation14_spill]] (!%p592_p9) }
  0x24   : > { %595 = sbr.rel (%p592_p9) target bundleno = 2086 (0x826), region = 104  ;;  %s1719_s29 = sld [smem:[#allocation17_spill]] (!%p592_p9) }
  0x25   : > { %s1721_s24 = sld [smem:[#allocation15_spill]] (!%p592_p9)  ;;  %s1274_s27 = smov (!%p592_p9), 32  }
  0x26   : > { %s1723_s8 = sld [smem:[#allocation21_spill]] (!%p592_p9)  ;;  %s647_s0 = sand.u32 (!%p592_p9), 1, %s1261_s4  }
  0x27   : > { %s1725_s9 = sld [smem:[#allocation22_spill]] (!%p592_p9)  ;;  %s1125_s26 = sshll.u32 (!%p592_p9), %s647_s0, 3 }
  0x28   : > { %s1726_s7 = sld [smem:[#allocation20_spill]] (!%p592_p9) }
  0x29   : > { %s651_s3 = scalar_select %p650_p10, %s1414_s1, 3  ;;  %vm657_vm0 = vcmask 261120   ;;  %v1271_v2 = vmov 32.0   ;;  %v1187_v47 = vld [vmem:[%s1678_s10] ss:$0 sm:$0xff]  ;;  %vm799_vm5 = vcmask 64512  }
  0x2a   : > { %1195 = vrcp.f32 %v1271_v2  ;;  %v698_v14 = vld [vmem:[%s1719_s29 + $0x18] sm:$0xff]  ;;  %v697_v16 = vld [vmem:[%s1719_s29 + $0x10] sm:$0xff]  ;;  %v696_v18 = vld [vmem:[%s1719_s29 + $0x8] sm:$0xff]  ;;  %s1039_s5 = sld [smem:[#allocation3]] }
  0x2b   : > { %s1126_s28 = sshll.u32 %s651_s3, 3  ;;  %718 = vmatpush.msra.mxu0 %v698_v14  ;;  %v695_v20 = vld [vmem:[%s1719_s29] sm:$0xff]  ;;  %s1724_s3 = sld [smem:[#allocation18_spill]]  ;;  %v831_v55 = vld [vmem:[%s1680_s12 + $0x18] sm:$0xff]  ;;  %v830_v56 = vld [vmem:[%s1680_s12 + $0x10] sm:$0xff] }
  0x2c   : > { %s653_s25 = scalar_lea.vmem %s1718_s6, %s1126_s28  ;;  %v1183_v31 = vld [vmem:[%s1721_s24] ss:$0 sm:$0xff]  ;;  %s1722_s28 = sld [smem:[#allocation16_spill]]  ;;  %v762_v37 = vld [vmem:[%s1723_s8 + $0x18] sm:$0xff]  ;;  %v761_v38 = vld [vmem:[%s1723_s8 + $0x10] sm:$0xff] }
  0x2d   : > { %v1446_v0 = vld [vmem:[%s653_s25] sm:$0xff]  ;;  %s1720_s25 = sld [smem:[#allocation19_spill]]  ;;  %719 = vmatpush.msra.mxu0 %v697_v16  ;;  %778 = vmatpush.msra.mxu3 %v762_v37  ;;  %v760_v39 = vld [vmem:[%s1723_s8 + $0x8] sm:$0xff]  ;;  %s1135_s6 = sshll.u32 %s1414_s1, 3 }
  0x2e   : > { %v658_v1 = vsel %vm657_vm0, %v1446_v0, 0.0  ;;  %v759_v43 = vld [vmem:[%s1723_s8] sm:$0xff]  ;;  %v829_v57 = vld [vmem:[%s1680_s12 + $0x8] sm:$0xff] }
  0x2f   : > { %659 = vadd.xlane.f32.xlu0 %v658_v1  ;;  %720 = vmatpush.msra.mxu0 %v696_v18  ;;  %v798_v46 = vld [vmem:[%s1725_s9] sm:$0xff] }
  0x30   : > { %v1196_v3 = vpop.eup %1195  ;;  %779 = vmatpush.msra.mxu3 %v761_v38  ;;  %v1188_v51 = vld [vmem:[%s1679_s11] ss:$0 sm:$0xff] }
  0x31   : > { %v662_v4 = vmul.f32 32.0, %v1196_v3  ;;  %vm666_vm1 = vweird.f32 %v1196_v3  ;;  %721 = vmatpush.msra.mxu0 %v695_v20  ;;  %v1185_v40 = vld [vmem:[%s1724_s3] ss:$0 sm:$0xff]  ;;  %s1273_s3 = smov 64  }
  0x32   : > { %v1184_v34 = vld [vmem:[%s1722_s28] ss:$0 sm:$0xff]  ;;  %780 = vmatpush.msra.mxu3 %v760_v39  ;;  %s1272_s28 = smov 96  }
  0x33   : > { %v663_v5 = vsub.f32 1.0, %v662_v4  ;;  %v729_v15 = vld [vmem:[%s1720_s25 + $0x18] sm:$0xff]  ;;  %v728_v17 = vld [vmem:[%s1720_s25 + $0x10] sm:$0xff]  ;;  %v727_v19 = vld [vmem:[%s1720_s25 + $0x8] sm:$0xff] }
  0x34   : > { %746 = vmatpush.msra.mxu1 %v729_v15  ;;  %v726_v21 = vld [vmem:[%s1720_s25] sm:$0xff]  ;;  %781 = vmatpush.msra.mxu3 %v759_v43 }
  0x35   : > { %v664_v6 = vmul.f32 %v1196_v3, %v663_v5  ;;  %v828_v58 = vld [vmem:[%s1680_s12] sm:$0xff] }
  0x36   : > { %747 = vmatpush.msra.mxu1 %v728_v17  ;;  %818 = vmatpush.msrb.mxu3 %v798_v46  ;;  %v1186_v1 = vld [vmem:[%s1726_s7] ss:$0 sm:$0xff]  ;;  %v1006_v46 = vld [vmem:[%s1688_s20 + $0x68] sm:$0xff] }
  0x37   : > { %v665_v7 = vadd.f32 %v1196_v3, %v664_v6  ;;  %v1189_v2 = vld [vmem:[%s1681_s13] ss:$0 sm:$0xff] }
  0x38   : > { %748 = vmatpush.msra.mxu1 %v727_v19  ;;  %v961_v43 = vld [vmem:[%s1686_s18] sm:$0xff] }
  0x39   : > { %v1450_v8 = vsel %vm666_vm1, %v1196_v3, %v665_v7 }
  0x3a   : > { %749 = vmatpush.msra.mxu1 %v726_v21 }
  0xa2   : > { %v660_v9 = vpop.xlane.xlu0 %659 }
  0xa3   : > { %v668_v10 = vmul.f32 %v1450_v8, %v660_v9 }
  0xa5   : > { %v669_v11 = vsub.f32 %v1446_v0, %v668_v10 }
  0xa7   : > { %v670_v12 = vmul.f32 %v669_v11, %v669_v11 }
  0xa9   : > { %v671_v13 = vsel %vm657_vm0, %v670_v12, 0.0 }
  0xaa   : > { %672 = vadd.xlane.f32.xlu0 %v671_v13 }
 0x11d   : > { %v673_v22 = vpop.xlane.xlu0 %672 }
 0x11e   : > { %v674_v23 = vmul.f32 %v673_v22, %v1450_v8 }
 0x120   : > { %v675_v24 = vadd.f32 1e-05, %v674_v23 }
 0x122   : > { %1197 = vrsqrt.f32 %v675_v24  ;;  %vm682_vm3 = vweird.f32 %v675_v24 }
 0x128   : > { %v1198_v25 = vpop.eup %1197 }
 0x129   : > { %v677_v26 = vmul.f32 %v1198_v25, %v675_v24  ;;  %vm683_vm2 = vweird.f32 %v1198_v25  ;;  %v898_v24 = vld [vmem:[%s1682_s14 + $0x18] sm:$0xff] }
 0x12a   : > { %vm684_vm4 = vmor %vm682_vm3, %vm683_vm2  ;;  %920 = vmatpush.msrb.mxu0 %v898_v24 }
 0x12b   : > { %v678_v27 = vmul.f32 %v1198_v25, %v677_v26  ;;  %v896_v26 = vld [vmem:[%s1682_s14 + $0x8] sm:$0xff] }
 0x12d   : > { %v679_v28 = vmul.f32 0.5, %v678_v27  ;;  %v895_v27 = vld [vmem:[%s1682_s14] sm:$0xff] }
 0x12f   : > { %v680_v29 = vsub.f32 1.5, %v679_v28 }
 0x131   : > { %v681_v30 = vmul.f32 %v1198_v25, %v680_v29 }
 0x133   : > { %v685_v32 = vsel %vm684_vm4, %v1198_v25, %v681_v30  ;;  %v897_v25 = vld [vmem:[%s1682_s14 + $0x10] sm:$0xff] }
 0x134   : > { %v686_v33 = vmul.f32 %v685_v32, %v669_v11  ;;  %921 = vmatpush.msrb.mxu0 %v897_v25 }
 0x136   : > { %v690_v35 = vmul.f32 %v1183_v31, %v686_v33  ;;  %922 = vmatpush.msrb.mxu0 %v896_v26  ;;  %v1190_v31 = vld [vmem:[%s1683_s15] ss:$0 sm:$0xff] }
 0x138   : > { %v694_v36 = vadd.f32 %v1184_v34, %v690_v35  ;;  %923 = vmatpush.msrb.mxu0 %v895_v27 }
 0x13a   : > { %1127 = vmatmul.msk.f32.vlgmr.msra.gmra.mxu0 %vm657_vm0, %v694_v36  ;;  %1128 = vmatmul.msk.f32.vlgmr.msra.gmra.mxu1 %vm657_vm0, %v694_v36 }
 0x1b7   : > { %v723_v41 = vpop.f32.mrf.mxu0  ;;  %v751_v3 = vpop.f32.mrf.mxu1 }
 0x1b8   : > { %v724_v42 = vadd.f32 %v1185_v40, %v723_v41  ;;  %v752_v5 = vadd.f32 %v1186_v1, %v751_v3  ;;  %v964_v41 = vld [vmem:[%s1686_s18 + $0x18] sm:$0xff] }
 0x1b9   : > { %984 = vmatpush.msrb.mxu1 %v964_v41 }
 0x1ba   : > { %755 = vrot.lane.b32.xlu1 %v724_v42, %s1272_s28  ;;  %s649_s28 = scalar_lea.vmem [#allocation4], %s1125_s26  ;;  %s1227_s26 = scalar_lea.hbm %s1690_s22, 32 }
 0x1bb   : > { %s1059_s7 = sshll.u32 %s649_s28, 4  ;;  %s1060_s7 = int_to_ptr.vmem [resolvable:$true] %s1059_s7 }
 0x22c   : > { %v756_v44 = vpop.permute.xlu1 %755 }
 0x22d   : > { %v758_v45 = vmul.f32 %v756_v44, %v724_v42  ;;  %v1008_v44 = vld [vmem:[%s1688_s20 + $0x78] sm:$0xff] }
 0x22e   : > { %1013 = vmatpush.msra.mxu2 %v1008_v44 }
 0x22f   : > { %1129 = vmatmul.msk.f32.vlgmr.msra.gmra.mxu3 %vm657_vm0, %v758_v45  ;;  %v1007_v45 = vld [vmem:[%s1688_s20 + $0x70] sm:$0xff] }
 0x230   : > { %853 = vmatpush.msra.mxu3 %v831_v55  ;;  %1014 = vmatpush.msra.mxu2 %v1007_v45  ;;  %v1000_v55 = vld [vmem:[%s1688_s20 + $0x38] sm:$0xff] }
 0x232   : > { %854 = vmatpush.msra.mxu3 %v830_v56  ;;  %1015 = vmatpush.msra.mxu2 %v1006_v46 }
 0x234   : > { %855 = vmatpush.msra.mxu3 %v829_v57  ;;  %v999_v57 = vld [vmem:[%s1688_s20 + $0x30] sm:$0xff] }
 0x236   : > { %856 = vmatpush.msra.mxu3 %v828_v58 }
 0x2b2   : > { %v783_v48 = vpop.f32.mrf.mxu3 }
 0x2b3   : > { %v790_v49 = vsub.f32 %v783_v48, %v1187_v47 }
 0x2b5   : > { %v791_v50 = vmul.f32 1.442695, %v790_v49  ;;  %v1005_v49 = vld [vmem:[%s1688_s20 + $0x60] sm:$0xff] }
 0x2b6   : > { %1016 = vmatpush.msra.mxu2 %v1005_v49 }
 0x2b7   : > { %1199 = vpow2.f32 %v791_v50 }
 0x2bd   : > { %v1200_v52 = vpop.eup %1199 }
 0x2be   : > { %v797_v53 = vmul.f32 %v1200_v52, %v1188_v51  ;;  %v1004_v51 = vld [vmem:[%s1688_s20 + $0x58] sm:$0xff]  ;;  %v1003_v52 = vld [vmem:[%s1688_s20 + $0x50] sm:$0xff] }
 0x2bf   : > { %1017 = vmatpush.msra.mxu2 %v1004_v51 }
 0x2c0   : > { %1130 = vmatmul.msk.f32.vlgmr.msrb.gmra.mxu3 %vm799_vm5, %v797_v53  ;;  %v1001_v53 = vld [vmem:[%s1688_s20 + $0x40] sm:$0xff] }
 0x2c1   : > { %1018 = vmatpush.msra.mxu2 %v1003_v52 }
 0x343   : > { %v820_v54 = vpop.f32.mrf.mxu3 }
 0x344   : > { %824 = vrot.lane.b32.xlu1 %v820_v54, %s1273_s3 }
 0x3b6   : > { %v825_v59 = vpop.permute.xlu1 %824 }
 0x3b7   : > { %v827_v60 = vmul.f32 %v825_v59, %v724_v42  ;;  %v998_v59 = vld [vmem:[%s1688_s20 + $0x28] sm:$0xff] }
 0x3b9   : > { %837 = vrot.lane.b32.xlu2 %v827_v60, %s1273_s3 }
 0x3c1   : > { %881 = vrot.lane.b32.xlu2 %v827_v60, %s1274_s27 }
 0x413   : > { %v838_v61 = vpop.permute.xlu2 %837 }
 0x414   : > { %1131 = vmatmul.msk.f32.vlgmr.msra.gmra.mxu3 %vm657_vm0, %v838_v61  ;;  %v997_v61 = vld [vmem:[%s1688_s20 + $0x20] sm:$0xff] }
 0x41b   : > { %v882_v62 = vpop.permute.xlu2 %881 }
 0x41c   : > { %v884_v63 = vsub.f32 %v724_v42, %v882_v62  ;;  %v962_v42 = vld [vmem:[%s1686_s18 + $0x8] sm:$0xff] }
 0x41e   : > { %886 = vrot.lane.b32.xlu0 %v884_v63, %s1274_s27  ;;  %v996_v63 = vld [vmem:[%s1688_s20 + $0x18] sm:$0xff]  ;;  %s1057_s27 = scalar_lea.hbm %s1690_s22, %s1135_s6 }
 0x41f   : > { %s1061_s1 = sshll.u32 %s1057_s27, 4  ;;  %s1062_s1 = int_to_ptr.hbm [resolvable:$true] %s1061_s1 }
 0x420   : > { %s1221_s30 = sshra.s32 %s1062_s1, 4  ;;  %s1222_s30 = int_to_ptr.hbm [resolvable:$true] %s1221_s30 }
 0x421   : > { %s1223_s23 = scalar_lea.hbm %s1222_s30, 8  ;;  %p1228_p0 = scmp.lt.s32.totalorder %s1222_s30, %s1690_s22 }
 0x422   : > { %p1224_p11 = scmp.ne.s32.totalorder %s1222_s30, %s1223_s23  ;;  %p1229_p1 = scmp.lt.s32.totalorder %s1227_s26, %s1223_s23 }
 0x424   : > { %p1225_p12 = pnand %p1224_p11, %p1431_p5  ;;  %p1230_p2 = por %p1229_p1, %p1228_p0 }
 0x426   : > { %p1226_p13 = pneg %p1225_p12 }
 0x428   : > { %p1231_p3 = pnand %p1230_p2, %p1226_p13 }
 0x490   : > { %v887_v21 = vpop.permute.xlu0 %886 }
 0x497   : > { %v858_v4 = vpop.f32.mrf.mxu3 }
 0x498   : > { %v859_v6 = vadd.f32 %v1189_v2, %v858_v4  ;;  %v1191_v2 = vld [vmem:[%s1684_s16] ss:$0 sm:$0xff] }
 0x49a   : > { %v861_v7 = vadd.f32 %v859_v6, %v752_v5  ;;  %v1192_v5 = vld [vmem:[%s1685_s17] ss:$0 sm:$0xff] }
 0x49c   : > { %v1132_v9 = vmul.f32 -1.442695, %v861_v7 }
 0x49e   : > { %1201 = vpow2.f32 %v1132_v9  ;;  %v995_v9 = vld [vmem:[%s1688_s20 + $0x10] sm:$0xff] }
 0x4a4   : > { %v1202_v10 = vpop.eup %1201 }
 0x4a5   : > { %v865_v11 = vadd.f32 1.0, %v1202_v10  ;;  %v994_v10 = vld [vmem:[%s1688_s20 + $0x8] sm:$0xff] }
 0x4a7   : > { %1203 = vrcp.f32 %v865_v11  ;;  %v877_v15 = vand.u32 2147483648, %v865_v11  ;;  %v875_v17 = vand.u32 2147483647, %v865_v11  ;;  %vm871_vm7 = vweird.f32 %v865_v11 }
 0x4a9   : > { %v878_v19 = vor.u32 1.1754944e-38, %v877_v15  ;;  %vm876_vm9 = vcmp.eq.f32.partialorder %v875_v17, 8.507059e+37 }
 0x4ad   : > { %v1204_v12 = vpop.eup %1203 }
 0x4ae   : > { %v867_v13 = vmul.f32 %v1204_v12, %v865_v11  ;;  %vm872_vm6 = vweird.f32 %v1204_v12  ;;  %v993_v11 = vld [vmem:[%s1688_s20] sm:$0xff] }
 0x4af   : > { %vm873_vm8 = vmor %vm871_vm7, %vm872_vm6 }
 0x4b0   : > { %v868_v14 = vsub.f32 1.0, %v867_v13 }
 0x4b2   : > { %v869_v16 = vmul.f32 %v1204_v12, %v868_v14 }
 0x4b4   : > { %v870_v18 = vadd.f32 %v1204_v12, %v869_v16  ;;  %v1035_v16 = vlaneseq }
 0x4b6   : > { %v874_v20 = vsel %vm873_vm8, %v1204_v12, %v870_v18  ;;  %v1193_v12 = vld [vmem:[%s1687_s19] ss:$0 sm:$0xff]  ;;  %v1036_v17 = vshrl.u32 %v1035_v16, 7  ;;  %v1037_v18 = vstv %s1135_s6 }
 0x4b7   : > { %v879_v22 = vsel %vm876_vm9, %v878_v19, %v874_v20  ;;  %v1194_v19 = vld [vmem:[%s1689_s21] ss:$0 sm:$0xff] }
 0x4b8   : > { %v889_v23 = vmul.f32 %v887_v21, %v879_v22  ;;  %v1038_v20 = vadd.s32 %v1037_v18, %v1036_v17  ;;  %v1040_v21 = vstv %s1039_s5 }
 0x4ba   : > { %891 = vrot.lane.b32.xlu1 %v889_v23, %s1273_s3  ;;  %vm1041_vm13 = vcmp.lt.s32.totalorder %v1038_v20, %v1040_v21 }
 0x52c   : > { %v892_v28 = vpop.permute.xlu1 %891 }
 0x52d   : > { %v894_v29 = vadd.f32 %v892_v28, %v827_v60 }
 0x52f   : > { %904 = vrot.lane.b32.xlu2 %v894_v29, %s1273_s3  ;;  %s1047_s3 = scalar_lea.sflag [#allocation5], %s647_s0 }
 0x589   : > { %v905_v30 = vpop.permute.xlu2 %904 }
 0x58a   : > { %1133 = vmatmul.msk.f32.vlgmr.msrb.gmra.mxu0 %vm657_vm0, %v905_v30 }
 0x607   : > { %v925_v32 = vpop.f32.mrf.mxu0 }
 0x608   : > { %v926_v33 = vadd.f32 %v1190_v31, %v925_v32 }
 0x60a   : > { %v1553_v34 = vadd.f32 %v926_v33, %v1446_v0  ;;  %v963_v0 = vld [vmem:[%s1686_s18 + $0x10] sm:$0xff] }
 0x60b   : > { %985 = vmatpush.msrb.mxu1 %v963_v0 }
 0x60c   : > { %v931_v35 = vsel %vm657_vm0, %v1553_v34, 0.0 }
 0x60d   : > { %932 = vadd.xlane.f32.xlu1 %v931_v35  ;;  %986 = vmatpush.msrb.mxu1 %v962_v42 }
 0x60f   : > { %987 = vmatpush.msrb.mxu1 %v961_v43 }
 0x680   : > { %v933_v36 = vpop.xlane.xlu1 %932 }
 0x681   : > { %v934_v37 = vmul.f32 %v933_v36, %v1450_v8 }
 0x683   : > { %v935_v38 = vsub.f32 %v1553_v34, %v934_v37 }
 0x685   : > { %v936_v39 = vmul.f32 %v935_v38, %v935_v38 }
 0x687   : > { %v937_v40 = vsel %vm657_vm0, %v936_v39, 0.0 }
 0x688   : > { %938 = vadd.xlane.f32.xlu2 %v937_v40 }
 0x6fb   : > { %v939_v47 = vpop.xlane.xlu2 %938 }
 0x6fc   : > { %v940_v48 = vmul.f32 %v939_v47, %v1450_v8  ;;  %v1002_v8 = vld [vmem:[%s1688_s20 + $0x48] sm:$0xff] }
 0x6fd   : > { %1019 = vmatpush.msra.mxu2 %v1002_v8 }
 0x6fe   : > { %v941_v50 = vadd.f32 1e-05, %v940_v48 }
 0x6ff   : > { %1020 = vmatpush.msra.mxu2 %v1001_v53 }
 0x700   : > { %1205 = vrsqrt.f32 %v941_v50  ;;  %vm948_vm11 = vweird.f32 %v941_v50 }
 0x701   : > { %1021 = vmatpush.msra.mxu2 %v1000_v55 }
 0x703   : > { %1022 = vmatpush.msra.mxu2 %v999_v57 }
 0x705   : > { %1023 = vmatpush.msra.mxu2 %v998_v59 }
 0x706   : > { %v1206_v54 = vpop.eup %1205 }
 0x707   : > { %v943_v56 = vmul.f32 %v1206_v54, %v941_v50  ;;  %vm949_vm10 = vweird.f32 %v1206_v54  ;;  %1024 = vmatpush.msra.mxu2 %v997_v61 }
 0x708   : > { %vm950_vm12 = vmor %vm948_vm11, %vm949_vm10 }
 0x709   : > { %v944_v58 = vmul.f32 %v1206_v54, %v943_v56  ;;  %1025 = vmatpush.msra.mxu2 %v996_v63 }
 0x70b   : > { %v945_v60 = vmul.f32 0.5, %v944_v58  ;;  %1026 = vmatpush.msra.mxu2 %v995_v9 }
 0x70d   : > { %v946_v62 = vsub.f32 1.5, %v945_v60  ;;  %1027 = vmatpush.msra.mxu2 %v994_v10 }
 0x70f   : > { %v947_v1 = vmul.f32 %v1206_v54, %v946_v62  ;;  %1028 = vmatpush.msra.mxu2 %v993_v11 }
 0x711   : > { %v951_v3 = vsel %vm950_vm12, %v1206_v54, %v947_v1 }
 0x712   : > { %v952_v4 = vmul.f32 %v951_v3, %v935_v38 }
 0x714   : > { %v956_v6 = vmul.f32 %v1191_v2, %v952_v4 }
 0x716   : > { %v960_v7 = vadd.f32 %v1192_v5, %v956_v6 }
 0x718   : > { %1134 = vmatmul.msk.f32.vlgmr.msrb.gmra.mxu1 %vm657_vm0, %v960_v7 }
 0x795   : > { %v989_v13 = vpop.f32.mrf.mxu1 }
 0x796   : > { %v990_v14 = vadd.f32 %v1193_v12, %v989_v13 }
 0x798   : > { %v992_v15 = vmax.f32 %v990_v14, 0.0 }
 0x79a   : > { %1029 = vmatmul.f32.vlgmr.msra.gmra.mxu2 %v992_v15 }
 0x81d   : > { %v1030_v22 = vpop.f32.mrf.mxu2 }
 0x81e   : > { %v1031_v23 = vadd.f32 %v1194_v19, %v1030_v22 }
 0x820   : > { %v1033_v24 = vadd.f32 %v1031_v23, %v1553_v34 }
 0x822   : > { %v1044_v25 = vsel %vm1041_vm13, %v1033_v24, 0.0 }
 0x823   : > { %1045 = vst.msk [vmem:[%s649_s28] sm:$0xff] %vm657_vm0, %v1044_v25 }
 0x824   : > { %1234 = shalt.err (!%p1231_p3)
}
 0x825   : > { %1140 = dma.vmem_to_hbm [thread:$0]  (%p1431_p5), %s1060_s7, 128, %s1062_s1, %s1047_s3  }
 0x826 PF: > { %s1727_s0 = sld [smem:[#allocation9_spill]] }
 0x827   : > { %s1728_s28 = sld [smem:[#allocation7_spill]] }
 0x82c   : > { %p1146_p4 = scmp.ge.s32.totalorder %s1727_s0, 2 }
 0x82d   : > { %s1073_s9 = sand.u32 1, %s1728_s28  }
 0x82e   : > { %p1143_p7 = pnand %p1146_p4, %p1435_p6  ;;  %s1074_s5 = scalar_lea.sflag [#allocation5], %s1073_s9 }
 0x830   : > { %p1144_p8 = pneg %p1143_p7 }
 0x832   : > { %1252 = dma.done.wait (%p1144_p8), %s1074_s5, 128  }
 0x833   : > { %1254 = vsyncadd (%p1144_p8), %s1074_s5, 4294967168  ;;  %s1730_s23 = sld [smem:[#allocation10_spill]]  ;;  %s1733_s30 = smov %s1261_s4 }
 0x834   : > { %s1731_s6 = sld [smem:[#allocation8_spill]] }
 0x835   : > { %s1732_s0 = sld [smem:[#allocation11_spill]] }
 0x839   : > { %p33_p9 = scmp.ge.s32.totalorder %s1730_s23, 6  }
 0x83a   : > { %s1734_s4 = smov %s1731_s6 }
 0x83b   :  { %35 = sbr.rel (!%p33_p9) target bundleno = 21 (0x15), region = 139 }
 0x840   :  { %1080 = vsyncpa [#allocation5], 1 }
 0x841   :  { %1082 = vsyncpa [#allocation5 + $0x1], 1 }

// kernel: _forward_padded.7
= control target key start
LH: loop header
LB: loop body
LE: loop exit
PB: predicated region body
PF: predicated region fallthrough
CT: control target
= control target key end

     0   :  { %s1283_s30 = smov 0   ;;  %s1502_s0 = inlined_call_operand.<no memory space> [shape: s32[1], index: 0, kind: input, shape index: {}]   ;;  %s1503_s1 = inlined_call_operand.vmem [shape: f32[32,32], index: 1, kind: input, shape index: {}]   ;;  %s1504_s2 = inlined_call_operand.vmem [shape: f32[1,32], index: 2, kind: input, shape index: {}]   ;;  %s1505_s3 = inlined_call_operand.vmem [shape: f32[1,32], index: 3, kind: input, shape index: {}]   ;;  %s1506_s4 = inlined_call_operand.vmem [shape: f32[32,128], index: 4, kind: input, shape index: {}]   ;;  %s1507_s5 = inlined_call_operand.vmem [shape: f32[1,128], index: 5, kind: input, shape index: {}]   ;;  %s1508_s6 = inlined_call_operand.vmem [shape: f32[32,32], index: 6, kind: input, shape index: {}]   ;;  %s1509_s7 = inlined_call_operand.vmem [shape: f32[1,32], index: 7, kind: input, shape index: {}]   ;;  %s1510_s8 = inlined_call_operand.vmem [shape: f32[32,8], index: 8, kind: input, shape index: {}]   ;;  %s1511_s9 = inlined_call_operand.vmem [shape: f32[8,32], index: 9, kind: input, shape index: {}]   ;;  %s1512_s10 = inlined_call_operand.vmem [shape: f32[1,8], index: 10, kind: input, shape index: {}]   ;;  %s1513_s11 = inlined_call_operand.vmem [shape: f32[1,8], index: 11, kind: input, shape index: {}]   ;;  %s1514_s12 = inlined_call_operand.vmem [shape: f32[32,32], index: 12, kind: input, shape index: {}]   ;;  %s1515_s13 = inlined_call_operand.vmem [shape: f32[1,32], index: 13, kind: input, shape index: {}]   ;;  %s1516_s14 = inlined_call_operand.vmem [shape: f32[32,32], index: 14, kind: input, shape index: {}]   ;;  %s1517_s15 = inlined_call_operand.vmem [shape: f32[1,32], index: 15, kind: input, shape index: {}]   ;;  %s1518_s16 = inlined_call_operand.vmem [shape: f32[1,32], index: 16, kind: input, shape index: {}]   ;;  %s1519_s17 = inlined_call_operand.vmem [shape: f32[1,32], index: 17, kind: input, shape index: {}]   ;;  %s1520_s18 = inlined_call_operand.vmem [shape: f32[32,128], index: 18, kind: input, shape index: {}]   ;;  %s1521_s19 = inlined_call_operand.vmem [shape: f32[1,128], index: 19, kind: input, shape index: {}]   ;;  %s1522_s20 = inlined_call_operand.vmem [shape: f32[128,32], index: 20, kind: input, shape index: {}]   ;;  %s1523_s21 = inlined_call_operand.vmem [shape: f32[1,32], index: 21, kind: input, shape index: {}]   ;;  %s1524_s22 = inlined_call_operand.vmem [shape: f32[32,32], index: 22, kind: output, shape index: {}]  }
   0x1   :  { %1528 = sst [smem:[#allocation4_spill]] %s1502_s0 }
   0x2   :  { %1529 = sst [smem:[#allocation5_spill]] %s1503_s1 }
   0x3   :  { %1530 = sst [smem:[#allocation6_spill]] %s1504_s2 }
   0x4   :  { %1531 = sst [smem:[#allocation7_spill]] %s1505_s3 }
   0x5   :  { %1532 = sst [smem:[#allocation8_spill]] %s1506_s4 }
   0x6   :  { %1533 = sst [smem:[#allocation9_spill]] %s1507_s5 }
   0x7   :  { %1534 = sst [smem:[#allocation10_spill]] %s1508_s6 }
   0x8   :  { %s1535_s29 = sld [smem:[#allocation4_spill]] }
   0xe   :  { %27 = sst [smem:[#allocation3]] %s1535_s29 }
   0xf LB: > { %s1289_s4 = sadd.s32 4294967295, %s1159_s30   ;;  %p1103_p0 = scmp.ge.s32.totalorder %s1159_s30, 1  ;;  %s1159_s30 = sphi %s1283_s30, %s33_s30  }
  0x10   : > { %p588_p1 = scmp.lt.s32.totalorder %s1159_s30, 5 }
  0x12   : > { %p589_p2 = pnand %p1103_p0, %p588_p1 }
  0x13   : > { %p646_p3 = scmp.lt.s32.totalorder (!%p589_p2), %s1289_s4, 3  ;;  %s1536_s24 = sld [smem:[#allocation5_spill]] (!%p589_p2) }
  0x14   : > { %592 = sbr.rel (%p589_p2) target bundleno = 2068 (0x814), region = 104  ;;  %s1537_s2 = sld [smem:[#allocation8_spill]] (!%p589_p2) }
  0x15   : > { %s1538_s28 = sld [smem:[#allocation10_spill]] (!%p589_p2)  ;;  %s1114_s3 = sshll.u32 (!%p589_p2), %s1289_s4, 3 }
  0x16   : > { %s1540_s26 = sld [smem:[#allocation7_spill]] (!%p589_p2) }
  0x17   : > { %s1541_s25 = sld [smem:[#allocation9_spill]] (!%p589_p2) }
  0x18   : > { %s1039_s27 = sld [smem:[#allocation3]] (!%p589_p2) }
  0x19   : > { %s1295_s0 = scalar_select %p646_p3, %s1289_s4, 3  ;;  %vm657_vm0 = vcmask 261120   ;;  %v1161_v2 = vmov 32.0   ;;  %v762_v37 = vld [vmem:[%s1510_s8 + $0x18] sm:$0xff]  ;;  %v761_v38 = vld [vmem:[%s1510_s8 + $0x10] sm:$0xff]  ;;  %v760_v39 = vld [vmem:[%s1510_s8 + $0x8] sm:$0xff] }
  0x1a   : > { %1141 = vrcp.f32 %v1161_v2  ;;  %v698_v14 = vld [vmem:[%s1537_s2 + $0x18] sm:$0xff]  ;;  %v697_v16 = vld [vmem:[%s1537_s2 + $0x10] sm:$0xff]  ;;  %v696_v18 = vld [vmem:[%s1537_s2 + $0x8] sm:$0xff]  ;;  %778 = vmatpush.msra.mxu3 %v762_v37  ;;  %vm799_vm5 = vcmask 64512  }
  0x1b   : > { %s1527_s23 = sshll.u32 %s1295_s0, 3  ;;  %v729_v15 = vld [vmem:[%s1538_s28 + $0x18] sm:$0xff]  ;;  %718 = vmatpush.msra.mxu0 %v698_v14  ;;  %v728_v17 = vld [vmem:[%s1538_s28 + $0x10] sm:$0xff]  ;;  %v727_v19 = vld [vmem:[%s1538_s28 + $0x8] sm:$0xff] }
  0x1c   : > { %s649_s6 = scalar_lea.vmem %s1536_s24, %s1527_s23  ;;  %746 = vmatpush.msra.mxu1 %v729_v15  ;;  %v695_v20 = vld [vmem:[%s1537_s2] sm:$0xff]  ;;  %s1539_s24 = sld [smem:[#allocation6_spill]]  ;;  %779 = vmatpush.msra.mxu3 %v761_v38  ;;  %v831_v55 = vld [vmem:[%s1514_s12 + $0x18] sm:$0xff]  ;;  %v830_v56 = vld [vmem:[%s1514_s12 + $0x10] sm:$0xff] }
  0x1d   : > { %v1303_v0 = vld [vmem:[%s649_s6] sm:$0xff]  ;;  %719 = vmatpush.msra.mxu0 %v697_v16  ;;  %v829_v57 = vld [vmem:[%s1514_s12 + $0x8] sm:$0xff]  ;;  %s1164_s6 = smov 32  }
  0x1e   : > { %v658_v1 = vsel %vm657_vm0, %v1303_v0, 0.0  ;;  %747 = vmatpush.msra.mxu1 %v728_v17  ;;  %v726_v21 = vld [vmem:[%s1538_s28] sm:$0xff]  ;;  %780 = vmatpush.msra.mxu3 %v760_v39 }
  0x1f   : > { %659 = vadd.xlane.f32.xlu0 %v658_v1  ;;  %720 = vmatpush.msra.mxu0 %v696_v18  ;;  %v1130_v34 = vld [vmem:[%s1540_s26] ss:$0 sm:$0xff]  ;;  %s1162_s26 = smov 96  }
  0x20   : > { %v1142_v3 = vpop.eup %1141  ;;  %748 = vmatpush.msra.mxu1 %v727_v19  ;;  %v1131_v40 = vld [vmem:[%s1541_s25] ss:$0 sm:$0xff]  ;;  %s1163_s25 = smov 64  }
  0x21   : > { %v662_v4 = vmul.f32 32.0, %v1142_v3  ;;  %vm666_vm1 = vweird.f32 %v1142_v3  ;;  %721 = vmatpush.msra.mxu0 %v695_v20  ;;  %v759_v43 = vld [vmem:[%s1510_s8] sm:$0xff] }
  0x22   : > { %749 = vmatpush.msra.mxu1 %v726_v21  ;;  %v1129_v31 = vld [vmem:[%s1539_s24] ss:$0 sm:$0xff]  ;;  %781 = vmatpush.msra.mxu3 %v759_v43 }
  0x23   : > { %v663_v5 = vsub.f32 1.0, %v662_v4  ;;  %v798_v46 = vld [vmem:[%s1511_s9] sm:$0xff] }
  0x24   : > { %818 = vmatpush.msrb.mxu3 %v798_v46  ;;  %v1133_v47 = vld [vmem:[%s1512_s10] ss:$0 sm:$0xff]  ;;  %v1006_v46 = vld [vmem:[%s1522_s20 + $0x68] sm:$0xff] }
  0x25   : > { %v664_v6 = vmul.f32 %v1142_v3, %v663_v5  ;;  %v1134_v51 = vld [vmem:[%s1513_s11] ss:$0 sm:$0xff] }
  0x26   : > { %v828_v58 = vld [vmem:[%s1514_s12] sm:$0xff] }
  0x27   : > { %v665_v7 = vadd.f32 %v1142_v3, %v664_v6  ;;  %v1132_v1 = vld [vmem:[%s1509_s7] ss:$0 sm:$0xff] }
  0x28   : > { %v1135_v2 = vld [vmem:[%s1515_s13] ss:$0 sm:$0xff] }
  0x29   : > { %v1307_v8 = vsel %vm666_vm1, %v1142_v3, %v665_v7  ;;  %v961_v43 = vld [vmem:[%s1520_s18] sm:$0xff] }
  0x92   : > { %v660_v9 = vpop.xlane.xlu0 %659 }
  0x93   : > { %v668_v10 = vmul.f32 %v1307_v8, %v660_v9 }
  0x95   : > { %v669_v11 = vsub.f32 %v1303_v0, %v668_v10 }
  0x97   : > { %v670_v12 = vmul.f32 %v669_v11, %v669_v11 }
  0x99   : > { %v671_v13 = vsel %vm657_vm0, %v670_v12, 0.0 }
  0x9a   : > { %672 = vadd.xlane.f32.xlu0 %v671_v13 }
 0x10d   : > { %v673_v22 = vpop.xlane.xlu0 %672 }
 0x10e   : > { %v674_v23 = vmul.f32 %v673_v22, %v1307_v8 }
 0x110   : > { %v675_v24 = vadd.f32 1e-05, %v674_v23 }
 0x112   : > { %1143 = vrsqrt.f32 %v675_v24  ;;  %vm682_vm3 = vweird.f32 %v675_v24 }
 0x118   : > { %v1144_v25 = vpop.eup %1143 }
 0x119   : > { %v677_v26 = vmul.f32 %v1144_v25, %v675_v24  ;;  %vm683_vm2 = vweird.f32 %v1144_v25  ;;  %v898_v24 = vld [vmem:[%s1516_s14 + $0x18] sm:$0xff] }
 0x11a   : > { %vm684_vm4 = vmor %vm682_vm3, %vm683_vm2  ;;  %920 = vmatpush.msrb.mxu0 %v898_v24 }
 0x11b   : > { %v678_v27 = vmul.f32 %v1144_v25, %v677_v26  ;;  %v896_v26 = vld [vmem:[%s1516_s14 + $0x8] sm:$0xff] }
 0x11d   : > { %v679_v28 = vmul.f32 0.5, %v678_v27  ;;  %v895_v27 = vld [vmem:[%s1516_s14] sm:$0xff] }
 0x11f   : > { %v680_v29 = vsub.f32 1.5, %v679_v28 }
 0x121   : > { %v681_v30 = vmul.f32 %v1144_v25, %v680_v29 }
 0x123   : > { %v685_v32 = vsel %vm684_vm4, %v1144_v25, %v681_v30  ;;  %v897_v25 = vld [vmem:[%s1516_s14 + $0x10] sm:$0xff] }
 0x124   : > { %v686_v33 = vmul.f32 %v685_v32, %v669_v11  ;;  %921 = vmatpush.msrb.mxu0 %v897_v25 }
 0x126   : > { %v690_v35 = vmul.f32 %v1129_v31, %v686_v33  ;;  %922 = vmatpush.msrb.mxu0 %v896_v26  ;;  %v1136_v31 = vld [vmem:[%s1517_s15] ss:$0 sm:$0xff] }
 0x128   : > { %v694_v36 = vadd.f32 %v1130_v34, %v690_v35  ;;  %923 = vmatpush.msrb.mxu0 %v895_v27 }
 0x12a   : > { %1106 = vmatmul.msk.f32.vlgmr.msra.gmra.mxu0 %vm657_vm0, %v694_v36  ;;  %1107 = vmatmul.msk.f32.vlgmr.msra.gmra.mxu1 %vm657_vm0, %v694_v36 }
 0x1a7   : > { %v723_v41 = vpop.f32.mrf.mxu0  ;;  %v751_v3 = vpop.f32.mrf.mxu1 }
 0x1a8   : > { %v724_v42 = vadd.f32 %v1131_v40, %v723_v41  ;;  %v752_v5 = vadd.f32 %v1132_v1, %v751_v3  ;;  %v964_v41 = vld [vmem:[%s1520_s18 + $0x18] sm:$0xff] }
 0x1a9   : > { %984 = vmatpush.msrb.mxu1 %v964_v41 }
 0x1aa   : > { %755 = vrot.lane.b32.xlu1 %v724_v42, %s1162_s26 }
 0x21c   : > { %v756_v44 = vpop.permute.xlu1 %755 }
 0x21d   : > { %v758_v45 = vmul.f32 %v756_v44, %v724_v42  ;;  %v1008_v44 = vld [vmem:[%s1522_s20 + $0x78] sm:$0xff] }
 0x21e   : > { %1013 = vmatpush.msra.mxu2 %v1008_v44 }
 0x21f   : > { %1108 = vmatmul.msk.f32.vlgmr.msra.gmra.mxu3 %vm657_vm0, %v758_v45  ;;  %v1007_v45 = vld [vmem:[%s1522_s20 + $0x70] sm:$0xff] }
 0x220   : > { %853 = vmatpush.msra.mxu3 %v831_v55  ;;  %1014 = vmatpush.msra.mxu2 %v1007_v45  ;;  %v1000_v55 = vld [vmem:[%s1522_s20 + $0x38] sm:$0xff] }
 0x222   : > { %854 = vmatpush.msra.mxu3 %v830_v56  ;;  %1015 = vmatpush.msra.mxu2 %v1006_v46 }
 0x224   : > { %855 = vmatpush.msra.mxu3 %v829_v57  ;;  %v999_v57 = vld [vmem:[%s1522_s20 + $0x30] sm:$0xff] }
 0x226   : > { %856 = vmatpush.msra.mxu3 %v828_v58 }
 0x2a2   : > { %v783_v48 = vpop.f32.mrf.mxu3 }
 0x2a3   : > { %v790_v49 = vsub.f32 %v783_v48, %v1133_v47 }
 0x2a5   : > { %v791_v50 = vmul.f32 1.442695, %v790_v49  ;;  %v1005_v49 = vld [vmem:[%s1522_s20 + $0x60] sm:$0xff] }
 0x2a6   : > { %1016 = vmatpush.msra.mxu2 %v1005_v49 }
 0x2a7   : > { %1145 = vpow2.f32 %v791_v50 }
 0x2ad   : > { %v1146_v52 = vpop.eup %1145 }
 0x2ae   : > { %v797_v53 = vmul.f32 %v1146_v52, %v1134_v51  ;;  %v1004_v51 = vld [vmem:[%s1522_s20 + $0x58] sm:$0xff]  ;;  %v1003_v52 = vld [vmem:[%s1522_s20 + $0x50] sm:$0xff] }
 0x2af   : > { %1017 = vmatpush.msra.mxu2 %v1004_v51 }
 0x2b0   : > { %1109 = vmatmul.msk.f32.vlgmr.msrb.gmra.mxu3 %vm799_vm5, %v797_v53  ;;  %v1001_v53 = vld [vmem:[%s1522_s20 + $0x40] sm:$0xff] }
 0x2b1   : > { %1018 = vmatpush.msra.mxu2 %v1003_v52 }
 0x333   : > { %v820_v54 = vpop.f32.mrf.mxu3 }
 0x334   : > { %824 = vrot.lane.b32.xlu1 %v820_v54, %s1163_s25 }
 0x3a6   : > { %v825_v59 = vpop.permute.xlu1 %824 }
 0x3a7   : > { %v827_v60 = vmul.f32 %v825_v59, %v724_v42  ;;  %v998_v59 = vld [vmem:[%s1522_s20 + $0x28] sm:$0xff] }
 0x3a9   : > { %837 = vrot.lane.b32.xlu2 %v827_v60, %s1163_s25 }
 0x3b1   : > { %881 = vrot.lane.b32.xlu2 %v827_v60, %s1164_s6 }
 0x403   : > { %v838_v61 = vpop.permute.xlu2 %837 }
 0x404   : > { %1110 = vmatmul.msk.f32.vlgmr.msra.gmra.mxu3 %vm657_vm0, %v838_v61  ;;  %v997_v61 = vld [vmem:[%s1522_s20 + $0x20] sm:$0xff] }
 0x40b   : > { %v882_v62 = vpop.permute.xlu2 %881 }
 0x40c   : > { %v884_v63 = vsub.f32 %v724_v42, %v882_v62  ;;  %v962_v42 = vld [vmem:[%s1520_s18 + $0x8] sm:$0xff] }
 0x40e   : > { %886 = vrot.lane.b32.xlu0 %v884_v63, %s1164_s6  ;;  %v996_v63 = vld [vmem:[%s1522_s20 + $0x18] sm:$0xff] }
 0x480   : > { %v887_v21 = vpop.permute.xlu0 %886 }
 0x487   : > { %v858_v4 = vpop.f32.mrf.mxu3 }
 0x488   : > { %v859_v6 = vadd.f32 %v1135_v2, %v858_v4  ;;  %v1137_v2 = vld [vmem:[%s1518_s16] ss:$0 sm:$0xff] }
 0x48a   : > { %v861_v7 = vadd.f32 %v859_v6, %v752_v5  ;;  %v1138_v5 = vld [vmem:[%s1519_s17] ss:$0 sm:$0xff] }
 0x48c   : > { %v1111_v9 = vmul.f32 -1.442695, %v861_v7 }
 0x48e   : > { %1147 = vpow2.f32 %v1111_v9  ;;  %v995_v9 = vld [vmem:[%s1522_s20 + $0x10] sm:$0xff] }
 0x494   : > { %v1148_v10 = vpop.eup %1147 }
 0x495   : > { %v865_v11 = vadd.f32 1.0, %v1148_v10  ;;  %v994_v10 = vld [vmem:[%s1522_s20 + $0x8] sm:$0xff] }
 0x497   : > { %1149 = vrcp.f32 %v865_v11  ;;  %v877_v15 = vand.u32 2147483648, %v865_v11  ;;  %v875_v17 = vand.u32 2147483647, %v865_v11  ;;  %vm871_vm7 = vweird.f32 %v865_v11 }
 0x499   : > { %v878_v19 = vor.u32 1.1754944e-38, %v877_v15  ;;  %vm876_vm9 = vcmp.eq.f32.partialorder %v875_v17, 8.507059e+37 }
 0x49d   : > { %v1150_v12 = vpop.eup %1149 }
 0x49e   : > { %v867_v13 = vmul.f32 %v1150_v12, %v865_v11  ;;  %vm872_vm6 = vweird.f32 %v1150_v12  ;;  %v993_v11 = vld [vmem:[%s1522_s20] sm:$0xff] }
 0x49f   : > { %vm873_vm8 = vmor %vm871_vm7, %vm872_vm6 }
 0x4a0   : > { %v868_v14 = vsub.f32 1.0, %v867_v13 }
 0x4a2   : > { %v869_v16 = vmul.f32 %v1150_v12, %v868_v14 }
 0x4a4   : > { %v870_v18 = vadd.f32 %v1150_v12, %v869_v16  ;;  %v1035_v16 = vlaneseq }
 0x4a6   : > { %v874_v20 = vsel %vm873_vm8, %v1150_v12, %v870_v18  ;;  %v1139_v12 = vld [vmem:[%s1521_s19] ss:$0 sm:$0xff]  ;;  %v1036_v17 = vshrl.u32 %v1035_v16, 7  ;;  %v1037_v18 = vstv %s1114_s3 }
 0x4a7   : > { %v879_v22 = vsel %vm876_vm9, %v878_v19, %v874_v20  ;;  %v1140_v19 = vld [vmem:[%s1523_s21] ss:$0 sm:$0xff] }
 0x4a8   : > { %v889_v23 = vmul.f32 %v887_v21, %v879_v22  ;;  %v1038_v20 = vadd.s32 %v1037_v18, %v1036_v17  ;;  %v1040_v21 = vstv %s1039_s27 }
 0x4aa   : > { %891 = vrot.lane.b32.xlu1 %v889_v23, %s1163_s25  ;;  %vm1041_vm13 = vcmp.lt.s32.totalorder %v1038_v20, %v1040_v21 }
 0x51c   : > { %v892_v28 = vpop.permute.xlu1 %891 }
 0x51d   : > { %v894_v29 = vadd.f32 %v892_v28, %v827_v60 }
 0x51f   : > { %904 = vrot.lane.b32.xlu2 %v894_v29, %s1163_s25  ;;  %s1542_s25 = sshll.u32 %s1295_s0, 3 }
 0x520   : > { %s653_s24 = scalar_lea.vmem %s1524_s22, %s1542_s25 }
 0x579   : > { %v905_v30 = vpop.permute.xlu2 %904 }
 0x57a   : > { %1112 = vmatmul.msk.f32.vlgmr.msrb.gmra.mxu0 %vm657_vm0, %v905_v30 }
 0x5f7   : > { %v925_v32 = vpop.f32.mrf.mxu0 }
 0x5f8   : > { %v926_v33 = vadd.f32 %v1136_v31, %v925_v32 }
 0x5fa   : > { %v1410_v34 = vadd.f32 %v926_v33, %v1303_v0  ;;  %v963_v0 = vld [vmem:[%s1520_s18 + $0x10] sm:$0xff] }
 0x5fb   : > { %985 = vmatpush.msrb.mxu1 %v963_v0 }
 0x5fc   : > { %v931_v35 = vsel %vm657_vm0, %v1410_v34, 0.0 }
 0x5fd   : > { %932 = vadd.xlane.f32.xlu1 %v931_v35  ;;  %986 = vmatpush.msrb.mxu1 %v962_v42 }
 0x5ff   : > { %987 = vmatpush.msrb.mxu1 %v961_v43 }
 0x670   : > { %v933_v36 = vpop.xlane.xlu1 %932 }
 0x671   : > { %v934_v37 = vmul.f32 %v933_v36, %v1307_v8 }
 0x673   : > { %v935_v38 = vsub.f32 %v1410_v34, %v934_v37 }
 0x675   : > { %v936_v39 = vmul.f32 %v935_v38, %v935_v38 }
 0x677   : > { %v937_v40 = vsel %vm657_vm0, %v936_v39, 0.0 }
 0x678   : > { %938 = vadd.xlane.f32.xlu2 %v937_v40 }
 0x6eb   : > { %v939_v47 = vpop.xlane.xlu2 %938 }
 0x6ec   : > { %v940_v48 = vmul.f32 %v939_v47, %v1307_v8  ;;  %v1002_v8 = vld [vmem:[%s1522_s20 + $0x48] sm:$0xff] }
 0x6ed   : > { %1019 = vmatpush.msra.mxu2 %v1002_v8 }
 0x6ee   : > { %v941_v50 = vadd.f32 1e-05, %v940_v48 }
 0x6ef   : > { %1020 = vmatpush.msra.mxu2 %v1001_v53 }
 0x6f0   : > { %1151 = vrsqrt.f32 %v941_v50  ;;  %vm948_vm11 = vweird.f32 %v941_v50 }
 0x6f1   : > { %1021 = vmatpush.msra.mxu2 %v1000_v55 }
 0x6f3   : > { %1022 = vmatpush.msra.mxu2 %v999_v57 }
 0x6f5   : > { %1023 = vmatpush.msra.mxu2 %v998_v59 }
 0x6f6   : > { %v1152_v54 = vpop.eup %1151 }
 0x6f7   : > { %v943_v56 = vmul.f32 %v1152_v54, %v941_v50  ;;  %vm949_vm10 = vweird.f32 %v1152_v54  ;;  %1024 = vmatpush.msra.mxu2 %v997_v61 }
 0x6f8   : > { %vm950_vm12 = vmor %vm948_vm11, %vm949_vm10 }
 0x6f9   : > { %v944_v58 = vmul.f32 %v1152_v54, %v943_v56  ;;  %1025 = vmatpush.msra.mxu2 %v996_v63 }
 0x6fb   : > { %v945_v60 = vmul.f32 0.5, %v944_v58  ;;  %1026 = vmatpush.msra.mxu2 %v995_v9 }
 0x6fd   : > { %v946_v62 = vsub.f32 1.5, %v945_v60  ;;  %1027 = vmatpush.msra.mxu2 %v994_v10 }
 0x6ff   : > { %v947_v1 = vmul.f32 %v1152_v54, %v946_v62  ;;  %1028 = vmatpush.msra.mxu2 %v993_v11 }
 0x701   : > { %v951_v3 = vsel %vm950_vm12, %v1152_v54, %v947_v1 }
 0x702   : > { %v952_v4 = vmul.f32 %v951_v3, %v935_v38 }
 0x704   : > { %v956_v6 = vmul.f32 %v1137_v2, %v952_v4 }
 0x706   : > { %v960_v7 = vadd.f32 %v1138_v5, %v956_v6 }
 0x708   : > { %1113 = vmatmul.msk.f32.vlgmr.msrb.gmra.mxu1 %vm657_vm0, %v960_v7 }
 0x785   : > { %v989_v13 = vpop.f32.mrf.mxu1 }
 0x786   : > { %v990_v14 = vadd.f32 %v1139_v12, %v989_v13 }
 0x788   : > { %v992_v15 = vmax.f32 %v990_v14, 0.0 }
 0x78a   : > { %1029 = vmatmul.f32.vlgmr.msra.gmra.mxu2 %v992_v15 }
 0x80d   : > { %v1030_v22 = vpop.f32.mrf.mxu2 }
 0x80e   : > { %v1031_v23 = vadd.f32 %v1140_v19, %v1030_v22 }
 0x810   : > { %v1033_v24 = vadd.f32 %v1031_v23, %v1410_v34 }
 0x812   : > { %v1044_v25 = vsel %vm1041_vm13, %v1033_v24, 0.0 }
 0x813   : > { %1045 = vst.msk [vmem:[%s653_s24] sm:$0xff] %vm657_vm0, %v1044_v25 }
 0x814 PF: > { %s33_s30 = sadd.s32 1, %s1159_s30  }
 0x815   : > { %p30_p4 = scmp.ge.s32.totalorder %s33_s30, 6  }
 0x817   :  { %32 = sbr.rel (!%p30_p4) target bundleno = 15 (0xf), region = 134 }

</bundles_post_ra>
